<compile_context>
chip_gen: v7x
topology: tpu7x:2x2x1
jax: 0.10.0
libtpu: 0.0.40
codegen_flags: <defaults>
</compile_context>

<pallas_src>
import math
from functools import partial

import jax
import jax.numpy as jnp
from jax.experimental import pallas as pl
from jax.experimental.pallas import tpu as pltpu


def attention_layer_kernel(q_ref, k_ref, v_ref,
                           wq_ref, bq_ref, wk_ref, bk_ref,
                           wv_ref, bv_ref, wo_ref, bo_ref,
                           o_ref, kh_scr, vh_scr,
                           *, n_heads, d_keys, d_values):
    f32, bf16 = jnp.float32, jnp.bfloat16
    H, E, D = n_heads, d_keys, d_values

    # K/V projection only depends on the batch element -> compute once per
    # batch element (query-tile index 0) and keep head-major in VMEM scratch.
    @pl.when(pl.program_id(1) == 0)
    def _project_kv():
        k = k_ref[...].astype(bf16)                                  # (S, d_model)
        v = v_ref[...].astype(bf16)                                  # (S, d_model)
        S = k.shape[0]
        kp = jnp.dot(k, wk_ref[...].astype(bf16),
                     preferred_element_type=f32) + bk_ref[...]       # (S, H*E)
        vp = jnp.dot(v, wv_ref[...].astype(bf16),
                     preferred_element_type=f32) + bv_ref[...]       # (S, H*D)
        kh_scr[...] = jnp.swapaxes(kp.reshape(S, H, E), 0, 1).astype(bf16)
        vh_scr[...] = jnp.swapaxes(vp.reshape(S, H, D), 0, 1).astype(bf16)

    # Query projection for this query tile (lane-dense packed matmul, f32 acc).
    q = q_ref[...].astype(bf16)                                      # (TQ, d_model)
    TQ = q.shape[0]
    qp = jnp.dot(q, wq_ref[...].astype(bf16),
                 preferred_element_type=f32) + bq_ref[...]           # (TQ, H*E)
    qh = jnp.swapaxes(qp.reshape(TQ, H, E), 0, 1).astype(bf16)       # (H, TQ, E)

    kh = kh_scr[...]                                                 # (H, S, E)
    vh = vh_scr[...]                                                 # (H, S, D)

    # Batched scores; contraction on the last dims (no explicit K transpose).
    scale = 1.0 / math.sqrt(E)
    scores = jnp.einsum("hqe,hke->hqk", qh, kh,
                        preferred_element_type=f32) * scale          # (H, TQ, S)

    # Softmax over keys (f32 math; exp -> EUP, approx reciprocal -> EUP vrcp).
    m = jnp.max(scores, axis=-1, keepdims=True)
    p = jnp.exp(scores - m)
    p = p * pl.reciprocal(jnp.sum(p, axis=-1, keepdims=True), approx=True)

    # Per-head context; output projection folded in (sum over heads replaces
    # the head-concat + separate projection matmul).
    ctx = jnp.einsum("hqk,hkd->hqd", p.astype(bf16), vh,
                     preferred_element_type=f32)                     # (H, TQ, D)
    outh = jnp.einsum("hqd,hdm->hqm", ctx.astype(bf16),
                      wo_ref[...].astype(bf16),
                      preferred_element_type=f32)                    # (H, TQ, d_model)
    o_ref[...] = (jnp.sum(outh, axis=0) + bo_ref[...]).astype(o_ref.dtype)


def attention_layer(queries, keys, values, params, n_heads, attn_mask=None):
    """Pallas wrapper. Returns (output, attn); attn is None (output_attention=False).

    attn_mask is ignored: the inner attention is FullAttention(mask_flag=False).
    """
    # TODO(synk): masked attention (attn_mask / mask_flag=True) is not implemented.
    del attn_mask
    B, L, d_model = queries.shape
    _, S, _ = keys.shape
    wq, bq, wk, bk, wv, bv, wo, bo = params
    H = n_heads
    d_keys = wq.shape[1] // H
    d_values = wv.shape[1] // H

    # Reshape params once in the wrapper so the kernel never slices weights.
    wo3 = wo.reshape(H, d_values, d_model)          # (H, D, d_model)
    bq2 = bq.reshape(1, H * d_keys)
    bk2 = bk.reshape(1, H * d_keys)
    bv2 = bv.reshape(1, H * d_values)
    bo2 = bo.reshape(1, d_model)

    TQ = L if L <= 256 else 256                     # full L, or multiple of 8
    grid = (B, pl.cdiv(L, TQ))

    kernel = partial(attention_layer_kernel, n_heads=H,
                     d_keys=d_keys, d_values=d_values)

    scratch_shapes = [
        pltpu.VMEM((H, S, d_keys), jnp.bfloat16),    # cached head-major K proj
        pltpu.VMEM((H, S, d_values), jnp.bfloat16),  # cached head-major V proj
    ]

    def _call(single_buffer_weights):
        def const_spec(shape):
            idx = lambda b, i: (0,) * len(shape)
            if single_buffer_weights:
                # Weights never change across the grid: single-buffer them.
                return pl.BlockSpec(shape, idx, pipeline_mode=pl.Buffered(1))
            return pl.BlockSpec(shape, idx)

        in_specs = [
            pl.BlockSpec((None, TQ, d_model), lambda b, i: (b, i, 0)),  # queries
            pl.BlockSpec((None, S, d_model), lambda b, i: (b, 0, 0)),   # keys
            pl.BlockSpec((None, S, d_model), lambda b, i: (b, 0, 0)),   # values
            const_spec(wq.shape), const_spec(bq2.shape),
            const_spec(wk.shape), const_spec(bk2.shape),
            const_spec(wv.shape), const_spec(bv2.shape),
            const_spec(wo3.shape), const_spec(bo2.shape),
        ]
        return pl.pallas_call(
            kernel,
            out_shape=jax.ShapeDtypeStruct((B, L, d_model), jnp.float32),
            grid=grid,
            in_specs=in_specs,
            out_specs=pl.BlockSpec((None, TQ, d_model), lambda b, i: (b, i, 0)),
            scratch_shapes=scratch_shapes,
            compiler_params=pltpu.CompilerParams(
                # batch axis parallel (megacore); query-tile axis sequential so
                # the K/V scratch computed at tile 0 is valid for later tiles.
                dimension_semantics=("parallel", "arbitrary")),
        )(queries, keys, values, wq, bq2, wk, bk2, wv, bv2, wo3, bo2)

    try:
        out = _call(True)
    except Exception:
        # pl.Buffered(1) not supported by this JAX version -> default buffering.
        out = _call(False)
    return out, None  # attn is None (FullAttention, output_attention=False)


def reference(queries, keys, values, params, n_heads):
    """Pure-JAX f32 reference mirroring the PyTorch forward (FullAttention, no mask)."""
    wq, bq, wk, bk, wv, bv, wo, bo = params
    B, L, _ = queries.shape
    _, S, _ = keys.shape
    H = n_heads
    q = (queries @ wq + bq).reshape(B, L, H, -1)
    k = (keys @ wk + bk).reshape(B, S, H, -1)
    v = (values @ wv + bv).reshape(B, S, H, -1)
    E = q.shape[-1]
    scores = jnp.einsum("blhe,bshe->bhls", q, k)
    a = jax.nn.softmax(scores / math.sqrt(E), axis=-1)
    out = jnp.einsum("bhls,bshd->blhd", a, v).reshape(B, L, -1)
    return out @ wo + bo


if __name__ == "__main__":
    B, L, S, d_model, n_heads = 2, 8, 8, 32, 4
    d_keys = d_values = d_model // n_heads

    key = jax.random.PRNGKey(0)
    ks = jax.random.split(key, 11)

    def init_w(k, shape):
        # deterministic small init (stand-in for nn.Linear's default init)
        return jax.random.uniform(k, shape, jnp.float32, -0.1, 0.1)

    wq = init_w(ks[0], (d_model, d_keys * n_heads))
    bq = init_w(ks[1], (1, d_keys * n_heads))
    wk = init_w(ks[2], (d_model, d_keys * n_heads))
    bk = init_w(ks[3], (1, d_keys * n_heads))
    wv = init_w(ks[4], (d_model, d_values * n_heads))
    bv = init_w(ks[5], (1, d_values * n_heads))
    wo = init_w(ks[6], (d_values * n_heads, d_model))
    bo = init_w(ks[7], (1, d_model))
    params = (wq, bq, wk, bk, wv, bv, wo, bo)

    queries = jax.random.normal(ks[8], (B, L, d_model), jnp.float32)
    keys = jax.random.normal(ks[9], (B, S, d_model), jnp.float32)
    values = jax.random.normal(ks[10], (B, S, d_model), jnp.float32)

    out, attn = attention_layer(queries, keys, values, params, n_heads)
    out = jax.block_until_ready(out)

    ref = reference(queries, keys, values, params, n_heads)
    assert out.shape == (B, L, d_model)
    assert attn is None
    # bf16 MXU operands + approx reciprocal -> loosened tolerance vs f32 reference
    assert jnp.allclose(out, ref, atol=2e-2, rtol=2e-2), \
        f"max abs diff {jnp.max(jnp.abs(out - ref))}"

    print("KERNEL_OK")
</pallas_src>

<mosaic_0001>
module attributes {stable_mosaic.version = 11 : i64} {
  func.func @attention_layer_kernel(%arg0: i32, %arg1: i32, %arg2: memref<1x8x32xf32, #tpu.memory_space<vmem>>, %arg3: memref<1x8x32xf32, #tpu.memory_space<vmem>>, %arg4: memref<1x8x32xf32, #tpu.memory_space<vmem>>, %arg5: memref<32x32xf32, #tpu.memory_space<vmem>>, %arg6: memref<1x32xf32, #tpu.memory_space<vmem>>, %arg7: memref<32x32xf32, #tpu.memory_space<vmem>>, %arg8: memref<1x32xf32, #tpu.memory_space<vmem>>, %arg9: memref<32x32xf32, #tpu.memory_space<vmem>>, %arg10: memref<1x32xf32, #tpu.memory_space<vmem>>, %arg11: memref<4x8x32xf32, #tpu.memory_space<vmem>>, %arg12: memref<1x32xf32, #tpu.memory_space<vmem>>, %arg13: memref<1x8x32xf32, #tpu.memory_space<vmem>>, %arg14: memref<4x8x8xbf16, #tpu.memory_space<vmem>>, %arg15: memref<4x8x8xbf16, #tpu.memory_space<vmem>>) attributes {dimension_semantics = [#tpu.dimension_semantics<parallel>, #tpu.dimension_semantics<arbitrary>], iteration_bounds = array<i64: 2, 1>, scalar_prefetch = 0 : i64, scratch_operands = 2 : i64, tpu.core_type = #tpu.core_type<tc>, window_params = [{transform_indices = @transform_0, window_bounds = array<i64: 1, 8, 32>}, {transform_indices = @transform_1, window_bounds = array<i64: 1, 8, 32>}, {transform_indices = @transform_2, window_bounds = array<i64: 1, 8, 32>}, {pipeline_mode = #tpu.pipeline_mode<synchronous>, transform_indices = @transform_3, window_bounds = array<i64: 32, 32>}, {pipeline_mode = #tpu.pipeline_mode<synchronous>, transform_indices = @transform_4, window_bounds = array<i64: 1, 32>}, {pipeline_mode = #tpu.pipeline_mode<synchronous>, transform_indices = @transform_5, window_bounds = array<i64: 32, 32>}, {pipeline_mode = #tpu.pipeline_mode<synchronous>, transform_indices = @transform_6, window_bounds = array<i64: 1, 32>}, {pipeline_mode = #tpu.pipeline_mode<synchronous>, transform_indices = @transform_7, window_bounds = array<i64: 32, 32>}, {pipeline_mode = #tpu.pipeline_mode<synchronous>, transform_indices = @transform_8, window_bounds = array<i64: 1, 32>}, {pipeline_mode = #tpu.pipeline_mode<synchronous>, transform_indices = @transform_9, window_bounds = array<i64: 4, 8, 32>}, {pipeline_mode = #tpu.pipeline_mode<synchronous>, transform_indices = @transform_10, window_bounds = array<i64: 1, 32>}, {transform_indices = @transform_11, window_bounds = array<i64: 1, 8, 32>}]} {
    %c0_i32 = arith.constant 0 : i32
    %0 = arith.cmpi eq, %arg1, %c0_i32 : i32
    %1 = arith.extui %0 : i1 to i32
    %c0_i32_0 = arith.constant 0 : i32
    %2 = arith.cmpi ne, %1, %c0_i32_0 : i32
    scf.if %2 {
      %c0_28 = arith.constant 0 : index
      %c0_29 = arith.constant 0 : index
      %c0_30 = arith.constant 0 : index
      %43 = vector.load %arg3[%c0_28, %c0_29, %c0_30] : memref<1x8x32xf32, #tpu.memory_space<vmem>>, vector<1x8x32xf32>
      %44 = vector.shape_cast %43 : vector<1x8x32xf32> to vector<8x32xf32>
      %45 = arith.truncf %44 : vector<8x32xf32> to vector<8x32xbf16>
      %c0_31 = arith.constant 0 : index
      %c0_32 = arith.constant 0 : index
      %c0_33 = arith.constant 0 : index
      %46 = vector.load %arg4[%c0_31, %c0_32, %c0_33] : memref<1x8x32xf32, #tpu.memory_space<vmem>>, vector<1x8x32xf32>
      %47 = vector.shape_cast %46 : vector<1x8x32xf32> to vector<8x32xf32>
      %48 = arith.truncf %47 : vector<8x32xf32> to vector<8x32xbf16>
      %c0_34 = arith.constant 0 : index
      %c0_35 = arith.constant 0 : index
      %49 = vector.load %arg7[%c0_34, %c0_35] : memref<32x32xf32, #tpu.memory_space<vmem>>, vector<32x32xf32>
      %50 = arith.truncf %49 : vector<32x32xf32> to vector<32x32xbf16>
      %cst_36 = arith.constant dense<0.000000e+00> : vector<8x32xf32>
      %51 = tpu.matmul %45, %50, %cst_36 {dimension_numbers = #tpu.dot_dimension_numbers<[1], [0], [0], [1], [0, 0, 1, 1], [], []>} : vector<8x32xbf16>, vector<32x32xbf16>, vector<8x32xf32> -> vector<8x32xf32>
      %c0_37 = arith.constant 0 : index
      %c0_38 = arith.constant 0 : index
      %52 = vector.load %arg8[%c0_37, %c0_38] : memref<1x32xf32, #tpu.memory_space<vmem>>, vector<1x32xf32>
      %53 = vector.broadcast %52 : vector<1x32xf32> to vector<8x32xf32>
      %54 = arith.addf %51, %53 : vector<8x32xf32>
      %c0_39 = arith.constant 0 : index
      %c0_40 = arith.constant 0 : index
      %55 = vector.load %arg9[%c0_39, %c0_40] : memref<32x32xf32, #tpu.memory_space<vmem>>, vector<32x32xf32>
      %56 = arith.truncf %55 : vector<32x32xf32> to vector<32x32xbf16>
      %cst_41 = arith.constant dense<0.000000e+00> : vector<8x32xf32>
      %57 = tpu.matmul %48, %56, %cst_41 {dimension_numbers = #tpu.dot_dimension_numbers<[1], [0], [0], [1], [0, 0, 1, 1], [], []>} : vector<8x32xbf16>, vector<32x32xbf16>, vector<8x32xf32> -> vector<8x32xf32>
      %c0_42 = arith.constant 0 : index
      %c0_43 = arith.constant 0 : index
      %58 = vector.load %arg10[%c0_42, %c0_43] : memref<1x32xf32, #tpu.memory_space<vmem>>, vector<1x32xf32>
      %59 = vector.broadcast %58 : vector<1x32xf32> to vector<8x32xf32>
      %60 = arith.addf %57, %59 : vector<8x32xf32>
      %61 = vector.shape_cast %54 : vector<8x32xf32> to vector<8x4x8xf32>
      %62 = tpu.transpose %61, [1, 0, 2] : vector<8x4x8xf32> -> vector<4x8x8xf32>
      %63 = arith.truncf %62 : vector<4x8x8xf32> to vector<4x8x8xbf16>
      %c0_44 = arith.constant 0 : index
      %c0_45 = arith.constant 0 : index
      %c0_46 = arith.constant 0 : index
      %64 = vector.load %arg14[%c0_44, %c0_45, %c0_46] : memref<4x8x8xbf16, #tpu.memory_space<vmem>>, vector<4x8x8xbf16>
      tpu.vector_store %arg14[%c0_44, %c0_45, %c0_46], %63 {strides = array<i32>} : memref<4x8x8xbf16, #tpu.memory_space<vmem>>, vector<4x8x8xbf16>,
      %65 = vector.shape_cast %60 : vector<8x32xf32> to vector<8x4x8xf32>
      %66 = tpu.transpose %65, [1, 0, 2] : vector<8x4x8xf32> -> vector<4x8x8xf32>
      %67 = arith.truncf %66 : vector<4x8x8xf32> to vector<4x8x8xbf16>
      %c0_47 = arith.constant 0 : index
      %c0_48 = arith.constant 0 : index
      %c0_49 = arith.constant 0 : index
      %68 = vector.load %arg15[%c0_47, %c0_48, %c0_49] : memref<4x8x8xbf16, #tpu.memory_space<vmem>>, vector<4x8x8xbf16>
      tpu.vector_store %arg15[%c0_47, %c0_48, %c0_49], %67 {strides = array<i32>} : memref<4x8x8xbf16, #tpu.memory_space<vmem>>, vector<4x8x8xbf16>,
    } else {
    }
    %c0 = arith.constant 0 : index
    %c0_1 = arith.constant 0 : index
    %c0_2 = arith.constant 0 : index
    %3 = vector.load %arg2[%c0, %c0_1, %c0_2] : memref<1x8x32xf32, #tpu.memory_space<vmem>>, vector<1x8x32xf32>
    %4 = vector.shape_cast %3 : vector<1x8x32xf32> to vector<8x32xf32>
    %5 = arith.truncf %4 : vector<8x32xf32> to vector<8x32xbf16>
    %c0_3 = arith.constant 0 : index
    %c0_4 = arith.constant 0 : index
    %6 = vector.load %arg5[%c0_3, %c0_4] : memref<32x32xf32, #tpu.memory_space<vmem>>, vector<32x32xf32>
    %7 = arith.truncf %6 : vector<32x32xf32> to vector<32x32xbf16>
    %cst = arith.constant dense<0.000000e+00> : vector<8x32xf32>
    %8 = tpu.matmul %5, %7, %cst {dimension_numbers = #tpu.dot_dimension_numbers<[1], [0], [0], [1], [0, 0, 1, 1], [], []>} : vector<8x32xbf16>, vector<32x32xbf16>, vector<8x32xf32> -> vector<8x32xf32>
    %c0_5 = arith.constant 0 : index
    %c0_6 = arith.constant 0 : index
    %9 = vector.load %arg6[%c0_5, %c0_6] : memref<1x32xf32, #tpu.memory_space<vmem>>, vector<1x32xf32>
    %10 = vector.broadcast %9 : vector<1x32xf32> to vector<8x32xf32>
    %11 = arith.addf %8, %10 : vector<8x32xf32>
    %12 = vector.shape_cast %11 : vector<8x32xf32> to vector<8x4x8xf32>
    %13 = tpu.transpose %12, [1, 0, 2] : vector<8x4x8xf32> -> vector<4x8x8xf32>
    %14 = arith.truncf %13 : vector<4x8x8xf32> to vector<4x8x8xbf16>
    %c0_7 = arith.constant 0 : index
    %c0_8 = arith.constant 0 : index
    %c0_9 = arith.constant 0 : index
    %15 = vector.load %arg14[%c0_7, %c0_8, %c0_9] : memref<4x8x8xbf16, #tpu.memory_space<vmem>>, vector<4x8x8xbf16>
    %c0_10 = arith.constant 0 : index
    %c0_11 = arith.constant 0 : index
    %c0_12 = arith.constant 0 : index
    %16 = vector.load %arg15[%c0_10, %c0_11, %c0_12] : memref<4x8x8xbf16, #tpu.memory_space<vmem>>, vector<4x8x8xbf16>
    "tpu.trace_start"() <{level = 10 : i32, message = "hqe,hke->hqk"}> : () -> ()
    %cst_13 = arith.constant dense<0.000000e+00> : vector<4x8x8xf32>
    %17 = tpu.matmul %14, %15, %cst_13 {dimension_numbers = #tpu.dot_dimension_numbers<[2], [2], [1], [1], [0, 0, 0, 1, 1, 1], [0], [0]>} : vector<4x8x8xbf16>, vector<4x8x8xbf16>, vector<4x8x8xf32> -> vector<4x8x8xf32>
    "tpu.trace_stop"() : () -> ()
    %cst_14 = arith.constant 0.353553385 : f32
    %18 = vector.broadcast %cst_14 : f32 to vector<4x8x8xf32>
    %19 = arith.mulf %17, %18 : vector<4x8x8xf32>
    %cst_15 = arith.constant dense<0xFF800000> : vector<4x8xf32>
    %20 = vector.multi_reduction <maximumf>, %19, %cst_15 [2] : vector<4x8x8xf32> to vector<4x8xf32>
    %21 = vector.shape_cast %20 : vector<4x8xf32> to vector<4x8x1xf32>
    %22 = vector.broadcast %21 : vector<4x8x1xf32> to vector<4x8x8xf32>
    %23 = arith.subf %19, %22 : vector<4x8x8xf32>
    %24 = math.exp %23 : vector<4x8x8xf32>
    %cst_16 = arith.constant dense<0.000000e+00> : vector<4x8xf32>
    %25 = vector.multi_reduction <add>, %24, %cst_16 [2] : vector<4x8x8xf32> to vector<4x8xf32>
    %26 = vector.shape_cast %25 : vector<4x8xf32> to vector<4x8x1xf32>
    %27 = tpu.reciprocal %26 {approx = true} : vector<4x8x1xf32> -> vector<4x8x1xf32>
    %28 = vector.broadcast %27 : vector<4x8x1xf32> to vector<4x8x8xf32>
    %29 = arith.mulf %24, %28 : vector<4x8x8xf32>
    %30 = arith.truncf %29 : vector<4x8x8xf32> to vector<4x8x8xbf16>
    "tpu.trace_start"() <{level = 10 : i32, message = "hqk,hkd->hqd"}> : () -> ()
    %cst_17 = arith.constant dense<0.000000e+00> : vector<4x8x8xf32>
    %31 = tpu.matmul %30, %16, %cst_17 {dimension_numbers = #tpu.dot_dimension_numbers<[2], [1], [1], [2], [0, 0, 0, 1, 1, 2], [0], [0]>} : vector<4x8x8xbf16>, vector<4x8x8xbf16>, vector<4x8x8xf32> -> vector<4x8x8xf32>
    "tpu.trace_stop"() : () -> ()
    %32 = arith.truncf %31 : vector<4x8x8xf32> to vector<4x8x8xbf16>
    %c0_18 = arith.constant 0 : index
    %c0_19 = arith.constant 0 : index
    %c0_20 = arith.constant 0 : index
    %33 = vector.load %arg11[%c0_18, %c0_19, %c0_20] : memref<4x8x32xf32, #tpu.memory_space<vmem>>, vector<4x8x32xf32>
    %34 = arith.truncf %33 : vector<4x8x32xf32> to vector<4x8x32xbf16>
    "tpu.trace_start"() <{level = 10 : i32, message = "hqd,hdm->hqm"}> : () -> ()
    %cst_21 = arith.constant dense<0.000000e+00> : vector<4x8x32xf32>
    %35 = tpu.matmul %32, %34, %cst_21 {dimension_numbers = #tpu.dot_dimension_numbers<[2], [1], [1], [2], [0, 0, 0, 1, 1, 2], [0], [0]>} : vector<4x8x8xbf16>, vector<4x8x32xbf16>, vector<4x8x32xf32> -> vector<4x8x32xf32>
    "tpu.trace_stop"() : () -> ()
    %cst_22 = arith.constant dense<0.000000e+00> : vector<8x32xf32>
    %36 = vector.multi_reduction <add>, %35, %cst_22 [0] : vector<4x8x32xf32> to vector<8x32xf32>
    %c0_23 = arith.constant 0 : index
    %c0_24 = arith.constant 0 : index
    %37 = vector.load %arg12[%c0_23, %c0_24] : memref<1x32xf32, #tpu.memory_space<vmem>>, vector<1x32xf32>
    %38 = vector.broadcast %37 : vector<1x32xf32> to vector<8x32xf32>
    %39 = arith.addf %36, %38 : vector<8x32xf32>
    %c0_25 = arith.constant 0 : index
    %c0_26 = arith.constant 0 : index
    %c0_27 = arith.constant 0 : index
    %40 = vector.load %arg13[%c0_25, %c0_26, %c0_27] : memref<1x8x32xf32, #tpu.memory_space<vmem>>, vector<1x8x32xf32>
    %41 = vector.shape_cast %40 : vector<1x8x32xf32> to vector<8x32xf32>
    %42 = vector.shape_cast %39 : vector<8x32xf32> to vector<1x8x32xf32>
    tpu.vector_store %arg13[%c0_25, %c0_26, %c0_27], %42 {strides = array<i32>} : memref<1x8x32xf32, #tpu.memory_space<vmem>>, vector<1x8x32xf32>,
    return
  }
  func.func @transform_0(%arg0: i32, %arg1: i32) -> (i32, i32, i32) {
    %c0_i32 = arith.constant 0 : i32
    %c0_i32_0 = arith.constant 0 : i32
    return %arg0, %arg1, %c0_i32 : i32, i32, i32
  }
  func.func @transform_1(%arg0: i32, %arg1: i32) -> (i32, i32, i32) {
    %c0_i32 = arith.constant 0 : i32
    %c0_i32_0 = arith.constant 0 : i32
    %c0_i32_1 = arith.constant 0 : i32
    return %arg0, %c0_i32, %c0_i32_0 : i32, i32, i32
  }
  func.func @transform_2(%arg0: i32, %arg1: i32) -> (i32, i32, i32) {
    %c0_i32 = arith.constant 0 : i32
    %c0_i32_0 = arith.constant 0 : i32
    %c0_i32_1 = arith.constant 0 : i32
    return %arg0, %c0_i32, %c0_i32_0 : i32, i32, i32
  }
  func.func @transform_3(%arg0: i32, %arg1: i32) -> (i32, i32) {
    %c0_i32 = arith.constant 0 : i32
    %c0_i32_0 = arith.constant 0 : i32
    %c0_i32_1 = arith.constant 0 : i32
    return %c0_i32, %c0_i32_0 : i32, i32
  }
  func.func @transform_4(%arg0: i32, %arg1: i32) -> (i32, i32) {
    %c0_i32 = arith.constant 0 : i32
    %c0_i32_0 = arith.constant 0 : i32
    %c0_i32_1 = arith.constant 0 : i32
    return %c0_i32, %c0_i32_0 : i32, i32
  }
  func.func @transform_5(%arg0: i32, %arg1: i32) -> (i32, i32) {
    %c0_i32 = arith.constant 0 : i32
    %c0_i32_0 = arith.constant 0 : i32
    %c0_i32_1 = arith.constant 0 : i32
    return %c0_i32, %c0_i32_0 : i32, i32
  }
  func.func @transform_6(%arg0: i32, %arg1: i32) -> (i32, i32) {
    %c0_i32 = arith.constant 0 : i32
    %c0_i32_0 = arith.constant 0 : i32
    %c0_i32_1 = arith.constant 0 : i32
    return %c0_i32, %c0_i32_0 : i32, i32
  }
  func.func @transform_7(%arg0: i32, %arg1: i32) -> (i32, i32) {
    %c0_i32 = arith.constant 0 : i32
    %c0_i32_0 = arith.constant 0 : i32
    %c0_i32_1 = arith.constant 0 : i32
    return %c0_i32, %c0_i32_0 : i32, i32
  }
  func.func @transform_8(%arg0: i32, %arg1: i32) -> (i32, i32) {
    %c0_i32 = arith.constant 0 : i32
    %c0_i32_0 = arith.constant 0 : i32
    %c0_i32_1 = arith.constant 0 : i32
    return %c0_i32, %c0_i32_0 : i32, i32
  }
  func.func @transform_9(%arg0: i32, %arg1: i32) -> (i32, i32, i32) {
    %c0_i32 = arith.constant 0 : i32
    %c0_i32_0 = arith.constant 0 : i32
    %c0_i32_1 = arith.constant 0 : i32
    %c0_i32_2 = arith.constant 0 : i32
    return %c0_i32, %c0_i32_0, %c0_i32_1 : i32, i32, i32
  }
  func.func @transform_10(%arg0: i32, %arg1: i32) -> (i32, i32) {
    %c0_i32 = arith.constant 0 : i32
    %c0_i32_0 = arith.constant 0 : i32
    %c0_i32_1 = arith.constant 0 : i32
    return %c0_i32, %c0_i32_0 : i32, i32
  }
  func.func @transform_11(%arg0: i32, %arg1: i32) -> (i32, i32, i32) {
    %c0_i32 = arith.constant 0 : i32
    %c0_i32_0 = arith.constant 0 : i32
    return %arg0, %arg1, %c0_i32 : i32, i32, i32
  }
}

module attributes {stable_mosaic.version = 11 : i64} {
  func.func @attention_layer_kernel(%arg0: i32, %arg1: i32, %arg2: memref<1x8x32xf32, #tpu.memory_space<vmem>>, %arg3: memref<1x8x32xf32, #tpu.memory_space<vmem>>, %arg4: memref<1x8x32xf32, #tpu.memory_space<vmem>>, %arg5: memref<32x32xf32, #tpu.memory_space<vmem>>, %arg6: memref<1x32xf32, #tpu.memory_space<vmem>>, %arg7: memref<32x32xf32, #tpu.memory_space<vmem>>, %arg8: memref<1x32xf32, #tpu.memory_space<vmem>>, %arg9: memref<32x32xf32, #tpu.memory_space<vmem>>, %arg10: memref<1x32xf32, #tpu.memory_space<vmem>>, %arg11: memref<4x8x32xf32, #tpu.memory_space<vmem>>, %arg12: memref<1x32xf32, #tpu.memory_space<vmem>>, %arg13: memref<1x8x32xf32, #tpu.memory_space<vmem>>, %arg14: memref<4x8x8xbf16, #tpu.memory_space<vmem>>, %arg15: memref<4x8x8xbf16, #tpu.memory_space<vmem>>) attributes {dimension_semantics = [#tpu.dimension_semantics<parallel>, #tpu.dimension_semantics<arbitrary>], iteration_bounds = array<i64: 2, 1>, scalar_prefetch = 0 : i64, scratch_operands = 2 : i64, tpu.core_type = #tpu.core_type<tc>, window_params = [{transform_indices = @transform_0, window_bounds = array<i64: 1, 8, 32>}, {transform_indices = @transform_1, window_bounds = array<i64: 1, 8, 32>}, {transform_indices = @transform_2, window_bounds = array<i64: 1, 8, 32>}, {pipeline_mode = #tpu.pipeline_mode<synchronous>, transform_indices = @transform_3, window_bounds = array<i64: 32, 32>}, {pipeline_mode = #tpu.pipeline_mode<synchronous>, transform_indices = @transform_4, window_bounds = array<i64: 1, 32>}, {pipeline_mode = #tpu.pipeline_mode<synchronous>, transform_indices = @transform_5, window_bounds = array<i64: 32, 32>}, {pipeline_mode = #tpu.pipeline_mode<synchronous>, transform_indices = @transform_6, window_bounds = array<i64: 1, 32>}, {pipeline_mode = #tpu.pipeline_mode<synchronous>, transform_indices = @transform_7, window_bounds = array<i64: 32, 32>}, {pipeline_mode = #tpu.pipeline_mode<synchronous>, transform_indices = @transform_8, window_bounds = array<i64: 1, 32>}, {pipeline_mode = #tpu.pipeline_mode<synchronous>, transform_indices = @transform_9, window_bounds = array<i64: 4, 8, 32>}, {pipeline_mode = #tpu.pipeline_mode<synchronous>, transform_indices = @transform_10, window_bounds = array<i64: 1, 32>}, {transform_indices = @transform_11, window_bounds = array<i64: 1, 8, 32>}]} {
    %c0_i32 = arith.constant 0 : i32
    %0 = arith.cmpi eq, %arg1, %c0_i32 : i32
    %1 = arith.extui %0 : i1 to i32
    %c0_i32_0 = arith.constant 0 : i32
    %2 = arith.cmpi ne, %1, %c0_i32_0 : i32
    scf.if %2 {
      %c0_28 = arith.constant 0 : index
      %c0_29 = arith.constant 0 : index
      %c0_30 = arith.constant 0 : index
      %43 = vector.load %arg3[%c0_28, %c0_29, %c0_30] : memref<1x8x32xf32, #tpu.memory_space<vmem>>, vector<1x8x32xf32>
      %44 = vector.shape_cast %43 : vector<1x8x32xf32> to vector<8x32xf32>
      %45 = arith.truncf %44 : vector<8x32xf32> to vector<8x32xbf16>
      %c0_31 = arith.constant 0 : index
      %c0_32 = arith.constant 0 : index
      %c0_33 = arith.constant 0 : index
      %46 = vector.load %arg4[%c0_31, %c0_32, %c0_33] : memref<1x8x32xf32, #tpu.memory_space<vmem>>, vector<1x8x32xf32>
      %47 = vector.shape_cast %46 : vector<1x8x32xf32> to vector<8x32xf32>
      %48 = arith.truncf %47 : vector<8x32xf32> to vector<8x32xbf16>
      %c0_34 = arith.constant 0 : index
      %c0_35 = arith.constant 0 : index
      %49 = vector.load %arg7[%c0_34, %c0_35] : memref<32x32xf32, #tpu.memory_space<vmem>>, vector<32x32xf32>
      %50 = arith.truncf %49 : vector<32x32xf32> to vector<32x32xbf16>
      %cst_36 = arith.constant dense<0.000000e+00> : vector<8x32xf32>
      %51 = tpu.matmul %45, %50, %cst_36 {dimension_numbers = #tpu.dot_dimension_numbers<[1], [0], [0], [1], [0, 0, 1, 1], [], []>} : vector<8x32xbf16>, vector<32x32xbf16>, vector<8x32xf32> -> vector<8x32xf32>
      %c0_37 = arith.constant 0 : index
      %c0_38 = arith.constant 0 : index
      %52 = vector.load %arg8[%c0_37, %c0_38] : memref<1x32xf32, #tpu.memory_space<vmem>>, vector<1x32xf32>
      %53 = vector.broadcast %52 : vector<1x32xf32> to vector<8x32xf32>
      %54 = arith.addf %51, %53 : vector<8x32xf32>
      %c0_39 = arith.constant 0 : index
      %c0_40 = arith.constant 0 : index
      %55 = vector.load %arg9[%c0_39, %c0_40] : memref<32x32xf32, #tpu.memory_space<vmem>>, vector<32x32xf32>
      %56 = arith.truncf %55 : vector<32x32xf32> to vector<32x32xbf16>
      %cst_41 = arith.constant dense<0.000000e+00> : vector<8x32xf32>
      %57 = tpu.matmul %48, %56, %cst_41 {dimension_numbers = #tpu.dot_dimension_numbers<[1], [0], [0], [1], [0, 0, 1, 1], [], []>} : vector<8x32xbf16>, vector<32x32xbf16>, vector<8x32xf32> -> vector<8x32xf32>
      %c0_42 = arith.constant 0 : index
      %c0_43 = arith.constant 0 : index
      %58 = vector.load %arg10[%c0_42, %c0_43] : memref<1x32xf32, #tpu.memory_space<vmem>>, vector<1x32xf32>
      %59 = vector.broadcast %58 : vector<1x32xf32> to vector<8x32xf32>
      %60 = arith.addf %57, %59 : vector<8x32xf32>
      %61 = vector.shape_cast %54 : vector<8x32xf32> to vector<8x4x8xf32>
      %62 = tpu.transpose %61, [1, 0, 2] : vector<8x4x8xf32> -> vector<4x8x8xf32>
      %63 = arith.truncf %62 : vector<4x8x8xf32> to vector<4x8x8xbf16>
      %c0_44 = arith.constant 0 : index
      %c0_45 = arith.constant 0 : index
      %c0_46 = arith.constant 0 : index
      %64 = vector.load %arg14[%c0_44, %c0_45, %c0_46] : memref<4x8x8xbf16, #tpu.memory_space<vmem>>, vector<4x8x8xbf16>
      tpu.vector_store %arg14[%c0_44, %c0_45, %c0_46], %63 {strides = array<i32>} : memref<4x8x8xbf16, #tpu.memory_space<vmem>>, vector<4x8x8xbf16>,
      %65 = vector.shape_cast %60 : vector<8x32xf32> to vector<8x4x8xf32>
      %66 = tpu.transpose %65, [1, 0, 2] : vector<8x4x8xf32> -> vector<4x8x8xf32>
      %67 = arith.truncf %66 : vector<4x8x8xf32> to vector<4x8x8xbf16>
      %c0_47 = arith.constant 0 : index
      %c0_48 = arith.constant 0 : index
      %c0_49 = arith.constant 0 : index
      %68 = vector.load %arg15[%c0_47, %c0_48, %c0_49] : memref<4x8x8xbf16, #tpu.memory_space<vmem>>, vector<4x8x8xbf16>
      tpu.vector_store %arg15[%c0_47, %c0_48, %c0_49], %67 {strides = array<i32>} : memref<4x8x8xbf16, #tpu.memory_space<vmem>>, vector<4x8x8xbf16>,
    } else {
    }
    %c0 = arith.constant 0 : index
    %c0_1 = arith.constant 0 : index
    %c0_2 = arith.constant 0 : index
    %3 = vector.load %arg2[%c0, %c0_1, %c0_2] : memref<1x8x32xf32, #tpu.memory_space<vmem>>, vector<1x8x32xf32>
    %4 = vector.shape_cast %3 : vector<1x8x32xf32> to vector<8x32xf32>
    %5 = arith.truncf %4 : vector<8x32xf32> to vector<8x32xbf16>
    %c0_3 = arith.constant 0 : index
    %c0_4 = arith.constant 0 : index
    %6 = vector.load %arg5[%c0_3, %c0_4] : memref<32x32xf32, #tpu.memory_space<vmem>>, vector<32x32xf32>
    %7 = arith.truncf %6 : vector<32x32xf32> to vector<32x32xbf16>
    %cst = arith.constant dense<0.000000e+00> : vector<8x32xf32>
    %8 = tpu.matmul %5, %7, %cst {dimension_numbers = #tpu.dot_dimension_numbers<[1], [0], [0], [1], [0, 0, 1, 1], [], []>} : vector<8x32xbf16>, vector<32x32xbf16>, vector<8x32xf32> -> vector<8x32xf32>
    %c0_5 = arith.constant 0 : index
    %c0_6 = arith.constant 0 : index
    %9 = vector.load %arg6[%c0_5, %c0_6] : memref<1x32xf32, #tpu.memory_space<vmem>>, vector<1x32xf32>
    %10 = vector.broadcast %9 : vector<1x32xf32> to vector<8x32xf32>
    %11 = arith.addf %8, %10 : vector<8x32xf32>
    %12 = vector.shape_cast %11 : vector<8x32xf32> to vector<8x4x8xf32>
    %13 = tpu.transpose %12, [1, 0, 2] : vector<8x4x8xf32> -> vector<4x8x8xf32>
    %14 = arith.truncf %13 : vector<4x8x8xf32> to vector<4x8x8xbf16>
    %c0_7 = arith.constant 0 : index
    %c0_8 = arith.constant 0 : index
    %c0_9 = arith.constant 0 : index
    %15 = vector.load %arg14[%c0_7, %c0_8, %c0_9] : memref<4x8x8xbf16, #tpu.memory_space<vmem>>, vector<4x8x8xbf16>
    %c0_10 = arith.constant 0 : index
    %c0_11 = arith.constant 0 : index
    %c0_12 = arith.constant 0 : index
    %16 = vector.load %arg15[%c0_10, %c0_11, %c0_12] : memref<4x8x8xbf16, #tpu.memory_space<vmem>>, vector<4x8x8xbf16>
    "tpu.trace_start"() <{level = 10 : i32, message = "hqe,hke->hqk"}> : () -> ()
    %cst_13 = arith.constant dense<0.000000e+00> : vector<4x8x8xf32>
    %17 = tpu.matmul %14, %15, %cst_13 {dimension_numbers = #tpu.dot_dimension_numbers<[2], [2], [1], [1], [0, 0, 0, 1, 1, 1], [0], [0]>} : vector<4x8x8xbf16>, vector<4x8x8xbf16>, vector<4x8x8xf32> -> vector<4x8x8xf32>
    "tpu.trace_stop"() : () -> ()
    %cst_14 = arith.constant 0.353553385 : f32
    %18 = vector.broadcast %cst_14 : f32 to vector<4x8x8xf32>
    %19 = arith.mulf %17, %18 : vector<4x8x8xf32>
    %cst_15 = arith.constant dense<0xFF800000> : vector<4x8xf32>
    %20 = vector.multi_reduction <maximumf>, %19, %cst_15 [2] : vector<4x8x8xf32> to vector<4x8xf32>
    %21 = vector.shape_cast %20 : vector<4x8xf32> to vector<4x8x1xf32>
    %22 = vector.broadcast %21 : vector<4x8x1xf32> to vector<4x8x8xf32>
    %23 = arith.subf %19, %22 : vector<4x8x8xf32>
    %24 = math.exp %23 : vector<4x8x8xf32>
    %cst_16 = arith.constant dense<0.000000e+00> : vector<4x8xf32>
    %25 = vector.multi_reduction <add>, %24, %cst_16 [2] : vector<4x8x8xf32> to vector<4x8xf32>
    %26 = vector.shape_cast %25 : vector<4x8xf32> to vector<4x8x1xf32>
    %27 = tpu.reciprocal %26 {approx = true} : vector<4x8x1xf32> -> vector<4x8x1xf32>
    %28 = vector.broadcast %27 : vector<4x8x1xf32> to vector<4x8x8xf32>
    %29 = arith.mulf %24, %28 : vector<4x8x8xf32>
    %30 = arith.truncf %29 : vector<4x8x8xf32> to vector<4x8x8xbf16>
    "tpu.trace_start"() <{level = 10 : i32, message = "hqk,hkd->hqd"}> : () -> ()
    %cst_17 = arith.constant dense<0.000000e+00> : vector<4x8x8xf32>
    %31 = tpu.matmul %30, %16, %cst_17 {dimension_numbers = #tpu.dot_dimension_numbers<[2], [1], [1], [2], [0, 0, 0, 1, 1, 2], [0], [0]>} : vector<4x8x8xbf16>, vector<4x8x8xbf16>, vector<4x8x8xf32> -> vector<4x8x8xf32>
    "tpu.trace_stop"() : () -> ()
    %32 = arith.truncf %31 : vector<4x8x8xf32> to vector<4x8x8xbf16>
    %c0_18 = arith.constant 0 : index
    %c0_19 = arith.constant 0 : index
    %c0_20 = arith.constant 0 : index
    %33 = vector.load %arg11[%c0_18, %c0_19, %c0_20] : memref<4x8x32xf32, #tpu.memory_space<vmem>>, vector<4x8x32xf32>
    %34 = arith.truncf %33 : vector<4x8x32xf32> to vector<4x8x32xbf16>
    "tpu.trace_start"() <{level = 10 : i32, message = "hqd,hdm->hqm"}> : () -> ()
    %cst_21 = arith.constant dense<0.000000e+00> : vector<4x8x32xf32>
    %35 = tpu.matmul %32, %34, %cst_21 {dimension_numbers = #tpu.dot_dimension_numbers<[2], [1], [1], [2], [0, 0, 0, 1, 1, 2], [0], [0]>} : vector<4x8x8xbf16>, vector<4x8x32xbf16>, vector<4x8x32xf32> -> vector<4x8x32xf32>
    "tpu.trace_stop"() : () -> ()
    %cst_22 = arith.constant dense<0.000000e+00> : vector<8x32xf32>
    %36 = vector.multi_reduction <add>, %35, %cst_22 [0] : vector<4x8x32xf32> to vector<8x32xf32>
    %c0_23 = arith.constant 0 : index
    %c0_24 = arith.constant 0 : index
    %37 = vector.load %arg12[%c0_23, %c0_24] : memref<1x32xf32, #tpu.memory_space<vmem>>, vector<1x32xf32>
    %38 = vector.broadcast %37 : vector<1x32xf32> to vector<8x32xf32>
    %39 = arith.addf %36, %38 : vector<8x32xf32>
    %c0_25 = arith.constant 0 : index
    %c0_26 = arith.constant 0 : index
    %c0_27 = arith.constant 0 : index
    %40 = vector.load %arg13[%c0_25, %c0_26, %c0_27] : memref<1x8x32xf32, #tpu.memory_space<vmem>>, vector<1x8x32xf32>
    %41 = vector.shape_cast %40 : vector<1x8x32xf32> to vector<8x32xf32>
    %42 = vector.shape_cast %39 : vector<8x32xf32> to vector<1x8x32xf32>
    tpu.vector_store %arg13[%c0_25, %c0_26, %c0_27], %42 {strides = array<i32>} : memref<1x8x32xf32, #tpu.memory_space<vmem>>, vector<1x8x32xf32>,
    return
  }
  func.func @transform_0(%arg0: i32, %arg1: i32) -> (i32, i32, i32) {
    %c0_i32 = arith.constant 0 : i32
    %c0_i32_0 = arith.constant 0 : i32
    return %arg0, %arg1, %c0_i32 : i32, i32, i32
  }
  func.func @transform_1(%arg0: i32, %arg1: i32) -> (i32, i32, i32) {
    %c0_i32 = arith.constant 0 : i32
    %c0_i32_0 = arith.constant 0 : i32
    %c0_i32_1 = arith.constant 0 : i32
    return %arg0, %c0_i32, %c0_i32_0 : i32, i32, i32
  }
  func.func @transform_2(%arg0: i32, %arg1: i32) -> (i32, i32, i32) {
    %c0_i32 = arith.constant 0 : i32
    %c0_i32_0 = arith.constant 0 : i32
    %c0_i32_1 = arith.constant 0 : i32
    return %arg0, %c0_i32, %c0_i32_0 : i32, i32, i32
  }
  func.func @transform_3(%arg0: i32, %arg1: i32) -> (i32, i32) {
    %c0_i32 = arith.constant 0 : i32
    %c0_i32_0 = arith.constant 0 : i32
    %c0_i32_1 = arith.constant 0 : i32
    return %c0_i32, %c0_i32_0 : i32, i32
  }
  func.func @transform_4(%arg0: i32, %arg1: i32) -> (i32, i32) {
    %c0_i32 = arith.constant 0 : i32
    %c0_i32_0 = arith.constant 0 : i32
    %c0_i32_1 = arith.constant 0 : i32
    return %c0_i32, %c0_i32_0 : i32, i32
  }
  func.func @transform_5(%arg0: i32, %arg1: i32) -> (i32, i32) {
    %c0_i32 = arith.constant 0 : i32
    %c0_i32_0 = arith.constant 0 : i32
    %c0_i32_1 = arith.constant 0 : i32
    return %c0_i32, %c0_i32_0 : i32, i32
  }
  func.func @transform_6(%arg0: i32, %arg1: i32) -> (i32, i32) {
    %c0_i32 = arith.constant 0 : i32
    %c0_i32_0 = arith.constant 0 : i32
    %c0_i32_1 = arith.constant 0 : i32
    return %c0_i32, %c0_i32_0 : i32, i32
  }
  func.func @transform_7(%arg0: i32, %arg1: i32) -> (i32, i32) {
    %c0_i32 = arith.constant 0 : i32
    %c0_i32_0 = arith.constant 0 : i32
    %c0_i32_1 = arith.constant 0 : i32
    return %c0_i32, %c0_i32_0 : i32, i32
  }
  func.func @transform_8(%arg0: i32, %arg1: i32) -> (i32, i32) {
    %c0_i32 = arith.constant 0 : i32
    %c0_i32_0 = arith.constant 0 : i32
    %c0_i32_1 = arith.constant 0 : i32
    return %c0_i32, %c0_i32_0 : i32, i32
  }
  func.func @transform_9(%arg0: i32, %arg1: i32) -> (i32, i32, i32) {
    %c0_i32 = arith.constant 0 : i32
    %c0_i32_0 = arith.constant 0 : i32
    %c0_i32_1 = arith.constant 0 : i32
    %c0_i32_2 = arith.constant 0 : i32
    return %c0_i32, %c0_i32_0, %c0_i32_1 : i32, i32, i32
  }
  func.func @transform_10(%arg0: i32, %arg1: i32) -> (i32, i32) {
    %c0_i32 = arith.constant 0 : i32
    %c0_i32_0 = arith.constant 0 : i32
    %c0_i32_1 = arith.constant 0 : i32
    return %c0_i32, %c0_i32_0 : i32, i32
  }
  func.func @transform_11(%arg0: i32, %arg1: i32) -> (i32, i32, i32) {
    %c0_i32 = arith.constant 0 : i32
    %c0_i32_0 = arith.constant 0 : i32
    return %arg0, %arg1, %c0_i32 : i32, i32, i32
  }
}

</mosaic_0001>

<bundles_post_ra>
// kernel: tpu_custom_call.1
= control target key start
LH: loop header
LB: loop body
LE: loop exit
PB: predicated region body
PF: predicated region fallthrough
CT: control target
= control target key end

     0   :  { %s3282_s0 = inlined_call_operand.hbm [shape: f32[2,8,32], index: 0, kind: input, shape index: {}]   ;;  %s3283_s1 = inlined_call_operand.hbm [shape: f32[2,8,32], index: 1, kind: input, shape index: {}]   ;;  %s3284_s2 = inlined_call_operand.hbm [shape: f32[2,8,32], index: 2, kind: input, shape index: {}]   ;;  %s3285_s3 = inlined_call_operand.hbm [shape: f32[32,32], index: 3, kind: input, shape index: {}]   ;;  %s3286_s4 = inlined_call_operand.vmem [shape: f32[1,32], index: 4, kind: input, shape index: {}]   ;;  %s3287_s5 = inlined_call_operand.hbm [shape: f32[32,32], index: 5, kind: input, shape index: {}]   ;;  %s3288_s6 = inlined_call_operand.vmem [shape: f32[1,32], index: 6, kind: input, shape index: {}]   ;;  %s3289_s7 = inlined_call_operand.hbm [shape: f32[32,32], index: 7, kind: input, shape index: {}]   ;;  %s3290_s8 = inlined_call_operand.hbm [shape: f32[1,32], index: 8, kind: input, shape index: {}]   ;;  %s3291_s9 = inlined_call_operand.vmem [shape: f32[4,8,32], index: 9, kind: input, shape index: {}]   ;;  %s3292_s10 = inlined_call_operand.vmem [shape: f32[1,32], index: 10, kind: input, shape index: {}]   ;;  %s3293_s11 = inlined_call_operand.hbm [shape: f32[2,8,32], index: 11, kind: output, shape index: {}]  }
   0x1   :  { %3319 = sst [smem:[#allocation30_spill]] %s3283_s1 }
   0x2   :  { %3320 = sst [smem:[#allocation31_spill]] %s3285_s3 }
   0x3   :  { %3321 = sst [smem:[#allocation32_spill]] %s3289_s7 }
   0x4   :  { %3322 = sst [smem:[#allocation33_spill]] %s3291_s9 }
   0x5   :  { %3323 = sst [smem:[#allocation34_spill]] %s3292_s10 }
   0x6   :  { %3324 = sst [smem:[#allocation35_spill]] %s3293_s11 }
   0x7   :  { %16 = vsyncpa [#allocation5], 0 }
   0x8   :  { %18 = vsyncpa [#allocation5 + $0x1], 0 }
   0x9   :  { %19 = vsyncpa [#allocation8], 0 }
   0xa   :  { %21 = vsyncpa [#allocation8 + $0x1], 0 }
   0xb   :  { %22 = vsyncpa [#allocation11], 0 }
   0xc   :  { %23 = vsyncpa [#allocation14], 0 }
   0xd   :  { %24 = vsyncpa [#allocation6], 0 }
   0xe   :  { %26 = vsyncpa [#allocation6 + $0x1], 0  ;;  %s2698_s17 = smov 0   ;;  %s2700_s18 = smov 0  }
   0xf   :  { %s2702_s19 = smov 0   ;;  %s2704_s20 = smov 0  }
  0x10   :  { %s2706_s21 = smov 0   ;;  %s2708_s22 = smov 0  }
  0x11 LB: > { %3325 = sst [smem:[#allocation22_spill]] %s2599_s17  ;;  %s2729_s23 = sadd.s32 4294967295, %s2619_s22   ;;  %s2619_s22 = sphi %s2708_s22, %s32_s22   ;;  %s2615_s21 = sphi %s2706_s21, %s3372_s21   ;;  %s2611_s20 = sphi %s2704_s20, %s3371_s20   ;;  %s2607_s19 = sphi %s2702_s19, %s3375_s19   ;;  %s2603_s18 = sphi %s2700_s18, %s3374_s18   ;;  %s2599_s17 = sphi %s2698_s17, %s3373_s17  }
  0x12   : > { %3326 = sst [smem:[#allocation23_spill]] %s2611_s20  ;;  %p2006_p0 = scmp.ge.s32.totalorder %s2619_s22, 1 }
  0x13   : > { %3327 = sst [smem:[#allocation24_spill]] %s2615_s21  ;;  %p3303_p1 = scmp.eq.s32.totalorder %s2729_s23, 0 }
  0x14   : > { %3328 = sst [smem:[#allocation25_spill]] %s2619_s22  ;;  %p325_p2 = scmp.lt.s32.totalorder %s2619_s22, 3 }
  0x15   : > { %s2621_s25 = smov [#allocation10]   ;;  %s2622_s28 = smov [#allocation13]  }
  0x16   : > { %p2734_p3 = pnand %p2006_p0, %p325_p2  ;;  %s337_s26 = sshll.u32 %s2621_s25, 4  ;;  %s2738_s26 = int_to_ptr.vmem [resolvable:$true] %s337_s26 }
  0x17   : > { %s369_s29 = sshll.u32 %s2622_s28, 4  ;;  %s3331_s3 = sld [smem:[#allocation31_spill]]  ;;  %s2749_s29 = int_to_ptr.vmem [resolvable:$true] %s369_s29 }
  0x18   : > { %s3329_s24 = scalar_select %p2734_p3, 1, 0 }
  0x19   : > { %p2209_p4 = pneg %p2734_p3 }
  0x1b   : > { %p2745_p6 = pnand %p2209_p4, %p3303_p1 }
  0x1d   : > { %s3330_s27 = scalar_select %p2745_p6, 1, 0 }
  0x1e   : > { %s2323_s13 = scalar_lea.hbm %s3331_s3, 512  ;;  %p2759_p8 = pneg %p2745_p6 }
  0x1f   : > { %p2324_p7 = scmp.ne.s32.totalorder %s3331_s3, %s2323_s13  ;;  %p2330_p11 = scmp.lt.u32.totalorder %s2323_s13, %s3331_s3 }
  0x20   : > { %s3332_s16 = scalar_select %p2759_p8, 1, 0 }
  0x21   : > { %p2326_p9 = pnand %p2759_p8, %p2324_p7 }
  0x23   : > { %p2327_p10 = pneg %p2326_p9 }
  0x25   : > { %p2332_p12 = pnand %p2330_p11, %p2327_p10 }
  0x27   : > { %2335 = shalt.err (!%p2332_p12)
}
  0x28   : > { %s2336_s30 = scalar_lea.vmem %s2738_s26, 512  ;;  %p2344_p4 = scmp.lt.s32.totalorder %s2738_s26, %s2738_s26 }
  0x29   : > { %p2337_p13 = scmp.ne.s32.totalorder %s2738_s26, %s2336_s30  ;;  %p2345_p5 = scmp.lt.s32.totalorder %s2336_s30, %s2336_s30 }
  0x2b   : > { %p2339_p0 = pnand %p2337_p13, %p2759_p8  ;;  %p2346_p7 = por %p2345_p5, %p2344_p4 }
  0x2d   : > { %p2340_p2 = pneg %p2339_p0 }
  0x2f   : > { %p2347_p9 = pnand %p2346_p7, %p2340_p2 }
  0x31   : > { %2350 = shalt.err (!%p2347_p9)
}
  0x32   : > { %s3296_s12 = smov 128   ;;  %s3297_s13 = smov 8  }
  0x33   : > { %2212 = dma.hbm_to_vmem [thread:$0]  (!%p2745_p6), %s3331_s3, 512, %s2738_s26, [#allocation11], %s3296_s12, %s3296_s12, %s3297_s13  }
  0x34   : > { %s3333_s7 = sld [smem:[#allocation32_spill]] }
  0x3a   : > { %s2351_s30 = scalar_lea.hbm %s3333_s7, 512 }
  0x3b   : > { %p2352_p5 = scmp.ne.s32.totalorder %s3333_s7, %s2351_s30  ;;  %p2358_p12 = scmp.lt.u32.totalorder %s2351_s30, %s3333_s7 }
  0x3d   : > { %p2354_p10 = pnand %p2352_p5, %p2759_p8 }
  0x3f   : > { %p2355_p11 = pneg %p2354_p10 }
  0x41   : > { %p2360_p13 = pnand %p2358_p12, %p2355_p11 }
  0x43   : > { %2363 = shalt.err (!%p2360_p13)
}
  0x44   : > { %s2364_s26 = scalar_lea.vmem %s2749_s29, 512  ;;  %p2372_p7 = scmp.lt.s32.totalorder %s2749_s29, %s2749_s29 }
  0x45   : > { %p2365_p0 = scmp.ne.s32.totalorder %s2749_s29, %s2364_s26  ;;  %p2373_p9 = scmp.lt.s32.totalorder %s2364_s26, %s2364_s26 }
  0x47   : > { %p2367_p2 = pnand %p2365_p0, %p2759_p8  ;;  %p2374_p5 = por %p2373_p9, %p2372_p7 }
  0x49   : > { %p2368_p4 = pneg %p2367_p2 }
  0x4b   : > { %p2375_p10 = pnand %p2374_p5, %p2368_p4 }
  0x4d   : > { %2378 = shalt.err (!%p2375_p10)
}
  0x4e   : > { %2218 = dma.hbm_to_vmem [thread:$0]  (!%p2745_p6), %s3333_s7, 512, %s2749_s29, [#allocation14], %s3296_s12, %s3296_s12, %s3297_s13  }
  0x4f   : > { %s2005_s11 = sadd.s32 4294967294, %s2619_s22   ;;  %s44_s20 = sadd.s32 1, %s2615_s21 }
  0x50   : > { %p46_p11 = scmp.ge.s32.totalorder %s44_s20, 2  ;;  %s53_s14 = sadd.s32 1, %s2607_s19 }
  0x51   : > { %p60_p12 = scmp.ne.s32.totalorder %s2607_s19, %s2603_s18  ;;  %p61_p13 = scmp.eq.s32.totalorder %s2619_s22, 0 }
  0x52   : > { %s3377_s20 = smov (%p46_p11, %s44_s20), 0  ;;  %p66_p2 = scmp.ne.s32.totalorder %s2603_s18, %s2599_s17 }
  0x53   : > { %3334 = sst [smem:[#allocation26_spill]] %s3377_s20  ;;  %p2817_p0 = por %p61_p13, %p60_p12 }
  0x54   : > { %s48_s29 = ssub.s32 %s2615_s21, %s3377_s20  ;;  %p312_p4 = scmp.eq.s32.totalorder %s2729_s23, 1 }
  0x55   : > { %p51_p7 = scmp.eq.s32.totalorder %s48_s29, 0  ;;  %p2828_p9 = por %p3303_p1, %p66_p2 }
  0x56   : > { %p2832_p5 = por %p312_p4, %p60_p12  ;;  %p318_p10 = scmp.eq.s32.totalorder %s2005_s11, 1 }
  0x57   : > { %s3336_s25 = scalar_select %p2828_p9, 1, 0 }
  0x58   : > { %s3337_s28 = scalar_select %p2832_p5, 1, 0 }
  0x59   : > { %s2837_s30 = scalar_select %p51_p7, %s2607_s19, %s53_s14  }
  0x5a   : > { %3338 = sst [smem:[#allocation27_spill]] %s3337_s28  ;;  %p2839_p11 = por %p318_p10, %p66_p2 }
  0x5b   : > { %3339 = sst [smem:[#allocation28_spill]] %s2837_s30  ;;  %p2240_p13 = scmp.lt.s32.totalorder %s2619_s22, 2 }
  0x5c   : > { %s3340_s26 = scalar_select %p2839_p11, 1, 0 }
  0x5d   : > { %s3298_s9 = sand.u32 1, %s2607_s19   ;;  %s2846_s10 = sshll.u32 %s2615_s21, 7 }
  0x5e   : > { %3341 = sst [smem:[#allocation29_spill]] %s3340_s26  ;;  %s2850_s29 = sshll.u32 %s3298_s9, 3 }
  0x5f   : > { %p2854_p12 = pnand %p2240_p13, %p2817_p0  ;;  %s419_s11 = sand.u32 1, %s2619_s22  }
  0x60   : > { %s3343_s1 = sld [smem:[#allocation30_spill]]  ;;  %s423_s7 = scalar_lea.vmem [#allocation7], %s2850_s29 }
  0x61   : > { %s3342_s12 = scalar_select %p2854_p12, 1, 0 }
  0x62   : > { %s430_s9 = sshll.u32 %s423_s7, 4  ;;  %s2868_s15 = scalar_lea.sflag [#allocation8], %s419_s11  ;;  %s2866_s9 = int_to_ptr.vmem [resolvable:$true] %s430_s9 }
  0x63   : > { %p2874_p2 = pneg %p2854_p12 }
  0x65   : > { %s3344_s21 = scalar_select %p2874_p2, 1, 0 }
  0x66   : > { %s2863_s3 = scalar_lea.hbm %s3343_s1, %s2846_s10  ;;  %s2384_s30 = scalar_lea.hbm %s3343_s1, 256 }
  0x67   : > { %s2379_s20 = scalar_lea.hbm %s2863_s3, 128  ;;  %p2385_p10 = scmp.lt.u32.totalorder %s2863_s3, %s3343_s1 }
  0x68   : > { %p2380_p0 = scmp.ne.s32.totalorder %s2863_s3, %s2379_s20  ;;  %p2386_p13 = scmp.lt.u32.totalorder %s2384_s30, %s2379_s20 }
  0x69   : > { %p2388_p11 = scmp.lt.u32.totalorder %s2379_s20, %s2863_s3 }
  0x6a   : > { %p2382_p4 = pnand %p2874_p2, %p2380_p0  ;;  %p2387_p1 = por %p2386_p13, %p2385_p10 }
  0x6c   : > { %p2383_p7 = pneg %p2382_p4  ;;  %p2389_p5 = por %p2388_p11, %p2387_p1 }
  0x6e   : > { %p2390_p9 = pnand %p2389_p5, %p2383_p7 }
  0x70   : > { %2393 = shalt.err (!%p2390_p9)
}
  0x71   : > { %s2394_s11 = scalar_lea.vmem %s2866_s9, 128  ;;  %s2625_s13 = smov [#allocation7]  }
  0x72   : > { %p2395_p0 = scmp.ne.s32.totalorder %s2866_s9, %s2394_s11  ;;  %s2399_s14 = sshll.u32 %s2625_s13, 4  ;;  %s2400_s14 = int_to_ptr.vmem [resolvable:$false] %s2399_s14 }
  0x73   : > { %s2401_s22 = scalar_lea.vmem %s2400_s14, 256  ;;  %p2402_p6 = scmp.lt.s32.totalorder %s2866_s9, %s2400_s14 }
  0x74   : > { %p2397_p4 = pnand %p2395_p0, %p2874_p2  ;;  %p2403_p8 = scmp.lt.s32.totalorder %s2401_s22, %s2394_s11 }
  0x76   : > { %p2398_p3 = pneg %p2397_p4  ;;  %p2404_p10 = por %p2403_p8, %p2402_p6 }
  0x78   : > { %p2405_p13 = pnand %p2404_p10, %p2398_p3 }
  0x7a   : > { %2408 = shalt.err (!%p2405_p13)
}
  0x7b   : > { %2228 = dma.hbm_to_vmem [thread:$0]  (!%p2854_p12), %s2863_s3, 128, %s2866_s9, %s2868_s15  }
  0x7c   : > { %s2626_s20 = smov [#allocation12]   ;;  %s2627_s7 = smov [#allocation15]  }
  0x7d   : > { %s353_s30 = sshll.u32 %s2626_s20, 4  ;;  %s383_s1 = sshll.u32 %s2627_s7, 4  ;;  %s354_s30 = int_to_ptr.vmem [resolvable:$true] %s353_s30  ;;  %s384_s1 = int_to_ptr.vmem [resolvable:$true] %s383_s1 }
  0x7e   : > { %s2409_s14 = scalar_lea.hbm %s3287_s5, 512  ;;  %p3345_p3 = scmp.ne.s32.totalorder %s3332_s16, 0 }
  0x7f   : > { %p2410_p1 = scmp.ne.s32.totalorder %s3287_s5, %s2409_s14  ;;  %p2416_p9 = scmp.lt.u32.totalorder %s2409_s14, %s3287_s5 }
  0x81   : > { %p2412_p6 = pnand %p2410_p1, %p3345_p3 }
  0x83   : > { %p2413_p8 = pneg %p2412_p6 }
  0x85   : > { %p2418_p5 = pnand %p2416_p9, %p2413_p8 }
  0x87   : > { %2421 = shalt.err (!%p2418_p5)
}
  0x88   : > { %s2422_s3 = scalar_lea.vmem %s354_s30, 512  ;;  %p2430_p4 = scmp.lt.s32.totalorder %s354_s30, %s354_s30 }
  0x89   : > { %p2423_p11 = scmp.ne.s32.totalorder %s354_s30, %s2422_s3  ;;  %p2431_p10 = scmp.lt.s32.totalorder %s2422_s3, %s2422_s3 }
  0x8b   : > { %p2425_p7 = pnand %p2423_p11, %p3345_p3  ;;  %p2432_p13 = por %p2431_p10, %p2430_p4 }
  0x8d   : > { %p2426_p0 = pneg %p2425_p7 }
  0x8f   : > { %p2433_p12 = pnand %p2432_p13, %p2426_p0 }
  0x91   : > { %2436 = shalt.err (!%p2433_p12)
}
  0x92   : > { %p3346_p1 = scmp.ne.s32.totalorder %s3330_s27, 0  ;;  %s3347_s26 = smov 8  }
  0x93   : > { %s3348_s9 = smov 128   ;;  %s2437_s13 = scalar_lea.hbm %s3290_s8, 16 }
  0x94   : > { %2215 = dma.hbm_to_vmem [thread:$0]  (!%p3346_p1), %s3287_s5, 512, %s354_s30, [#allocation11], %s3348_s9, %s3348_s9, %s3347_s26  }
  0x95   : > { %p2438_p6 = scmp.ne.s32.totalorder %s3290_s8, %s2437_s13  ;;  %p2444_p9 = scmp.lt.u32.totalorder %s2437_s13, %s3290_s8 }
  0x97   : > { %p2440_p12 = pnand %p2438_p6, %p3345_p3 }
  0x99   : > { %p2441_p8 = pneg %p2440_p12 }
  0x9b   : > { %p2446_p5 = pnand %p2444_p9, %p2441_p8 }
  0x9d   : > { %2449 = shalt.err (!%p2446_p5)
}
  0x9e   : > { %s2450_s17 = scalar_lea.vmem %s384_s1, 16  ;;  %s2457_s30 = scalar_lea.vmem %s384_s1, 32 }
  0x9f   : > { %p2451_p11 = scmp.ne.s32.totalorder %s384_s1, %s2450_s17  ;;  %p2458_p4 = scmp.lt.s32.totalorder %s384_s1, %s384_s1 }
  0xa0   : > { %p2459_p10 = scmp.lt.s32.totalorder %s2457_s30, %s2450_s17 }
  0xa1   : > { %p2453_p7 = pnand %p2451_p11, %p3345_p3 }
  0xa2   : > { %p2460_p13 = por %p2459_p10, %p2458_p4 }
  0xa3   : > { %p2454_p0 = pneg %p2453_p7 }
  0xa5   : > { %p2461_p2 = pnand %p2460_p13, %p2454_p0 }
  0xa7   : > { %2464 = shalt.err (!%p2461_p2)
}
  0xa8   : > { %2221 = dma.hbm_to_vmem [thread:$0]  (!%p3346_p1), %s3290_s8, 16, %s384_s1, [#allocation14]  }
  0xa9   : > { %s2941_s20 = scalar_lea.hbm %s3282_s0, %s2846_s10  ;;  %s404_s7 = scalar_lea.vmem [#allocation4], %s2850_s29 }
  0xaa   : > { %s412_s27 = sshll.u32 %s404_s7, 4  ;;  %s2950_s11 = scalar_lea.hbm %s3284_s2, %s2846_s10  ;;  %s2944_s27 = int_to_ptr.vmem [resolvable:$true] %s412_s27 }
  0xab   : > { %s3349_s22 = sand.u32 1, %s2607_s19   ;;  %s2465_s3 = scalar_lea.hbm %s2941_s20, 128 }
  0xac   : > { %s401_s1 = scalar_lea.sflag [#allocation5], %s3349_s22  ;;  %p2466_p2 = scmp.ne.s32.totalorder %s2941_s20, %s2465_s3 }
  0xad   : > { %p3350_p3 = scmp.ne.s32.totalorder %s3344_s21, 0  ;;  %s2470_s26 = scalar_lea.hbm %s3282_s0, 256 }
  0xae   : > { %p2471_p12 = scmp.lt.u32.totalorder %s2941_s20, %s3282_s0  ;;  %p2472_p8 = scmp.lt.u32.totalorder %s2470_s26, %s2465_s3 }
  0xaf   : > { %p2468_p1 = pnand %p2466_p2, %p3350_p3  ;;  %p2474_p5 = scmp.lt.u32.totalorder %s2465_s3, %s2941_s20 }
  0xb0   : > { %p2473_p9 = por %p2472_p8, %p2471_p12 }
  0xb1   : > { %p2469_p6 = pneg %p2468_p1 }
  0xb2   : > { %p2475_p11 = por %p2474_p5, %p2473_p9 }
  0xb4   : > { %p2476_p7 = pnand %p2475_p11, %p2469_p6 }
  0xb6   : > { %2479 = shalt.err (!%p2476_p7)
}
  0xb7   : > { %s2480_s10 = scalar_lea.vmem %s2944_s27, 128  ;;  %s2628_s28 = smov [#allocation4]  }
  0xb8   : > { %p2481_p0 = scmp.ne.s32.totalorder %s2944_s27, %s2480_s10  ;;  %s2485_s7 = sshll.u32 %s2628_s28, 4  ;;  %s2486_s7 = int_to_ptr.vmem [resolvable:$false] %s2485_s7 }
  0xb9   : > { %s2487_s13 = scalar_lea.vmem %s2486_s7, 256  ;;  %p2488_p13 = scmp.lt.s32.totalorder %s2944_s27, %s2486_s7 }
  0xba   : > { %p2483_p4 = pnand %p2481_p0, %p3350_p3  ;;  %p2489_p2 = scmp.lt.s32.totalorder %s2487_s13, %s2480_s10 }
  0xbc   : > { %p2484_p10 = pneg %p2483_p4  ;;  %p2490_p1 = por %p2489_p2, %p2488_p13 }
  0xbe   : > { %p2491_p12 = pnand %p2490_p1, %p2484_p10 }
  0xc0   : > { %2494 = shalt.err (!%p2491_p12)
}
  0xc1   : > { %p3351_p6 = scmp.ne.s32.totalorder %s3342_s12, 0  ;;  %s441_s14 = scalar_lea.vmem [#allocation9], %s2850_s29 }
  0xc2   : > { %s448_s22 = sshll.u32 %s441_s14, 4  ;;  %s2495_s3 = scalar_lea.hbm %s2950_s11, 128  ;;  %s449_s22 = int_to_ptr.vmem [resolvable:$true] %s448_s22 }
  0xc3   : > { %2225 = dma.hbm_to_vmem [thread:$0]  (!%p3351_p6), %s2941_s20, 128, %s2944_s27, %s401_s1  }
  0xc4   : > { %p2496_p8 = scmp.ne.s32.totalorder %s2950_s11, %s2495_s3  ;;  %s2500_s26 = scalar_lea.hbm %s3284_s2, 256 }
  0xc5   : > { %p2501_p11 = scmp.lt.u32.totalorder %s2950_s11, %s3284_s2  ;;  %p2502_p7 = scmp.lt.u32.totalorder %s2500_s26, %s2495_s3 }
  0xc6   : > { %p2498_p9 = pnand %p2496_p8, %p3350_p3  ;;  %p2504_p4 = scmp.lt.u32.totalorder %s2495_s3, %s2950_s11 }
  0xc7   : > { %p2503_p0 = por %p2502_p7, %p2501_p11 }
  0xc8   : > { %p2499_p5 = pneg %p2498_p9 }
  0xc9   : > { %p2505_p10 = por %p2504_p4, %p2503_p0 }
  0xcb   : > { %p2506_p13 = pnand %p2505_p10, %p2499_p5 }
  0xcd   : > { %2509 = shalt.err (!%p2506_p13)
}
  0xce   : > { %s2510_s29 = scalar_lea.vmem %s449_s22, 128  ;;  %s2629_s20 = smov [#allocation9]  }
  0xcf   : > { %p2511_p2 = scmp.ne.s32.totalorder %s449_s22, %s2510_s29  ;;  %s2515_s27 = sshll.u32 %s2629_s20, 4  ;;  %s2516_s27 = int_to_ptr.vmem [resolvable:$false] %s2515_s27 }
  0xd0   : > { %s2517_s1 = scalar_lea.vmem %s2516_s27, 256  ;;  %p2518_p8 = scmp.lt.s32.totalorder %s449_s22, %s2516_s27 }
  0xd1   : > { %p2513_p1 = pnand %p2511_p2, %p3350_p3  ;;  %p2519_p9 = scmp.lt.s32.totalorder %s2517_s1, %s2510_s29 }
  0xd3   : > { %p2514_p12 = pneg %p2513_p1  ;;  %p2520_p6 = por %p2519_p9, %p2518_p8 }
  0xd5   : > { %p2521_p7 = pnand %p2520_p6, %p2514_p12 }
  0xd7   : > { %2524 = shalt.err (!%p2521_p7)
}
  0xd8   : > { %p3352_p11 = scmp.ne.s32.totalorder %s3342_s12, 0  ;;  %p3353_p5 = scmp.ne.s32.totalorder %s3329_s24, 0 }
  0xd9   : > { %s2997_s21 = sand.u32 (!%p3353_p5), 1, %s2603_s18   ;;  %p3354_p3 = scmp.ne.s32.totalorder (!%p3353_p5), %s3336_s25, 0 }
  0xda   : > { %2231 = dma.hbm_to_vmem [thread:$0]  (!%p3352_p11), %s2950_s11, 128, %s449_s22, %s2868_s15  }
  0xdb   : > { %457 = sbr.rel (%p3353_p5) target bundleno = 1603 (0x643), region = 64  ;;  %s3000_s10 = sshll.u32 (!%p3353_p5), %s2997_s21, 3 }
  0xdc   : > { %s460_s28 = scalar_lea.sflag (!%p3353_p5), [#allocation5], %s2997_s21  ;;  %s463_s7 = scalar_lea.vmem (!%p3353_p5), [#allocation4], %s3000_s10 }
  0xe2   : > { %2578 = dma.done.wait (%p3354_p3), %s460_s28, 128  }
  0xe3   : > { %2580 = vsyncadd (%p3354_p3), %s460_s28, 4294967168  ;;  %s468_s24 = sand.u32 1, %s2729_s23   ;;  %s472_s15 = scalar_lea.vmem [#allocation7], %s3000_s10 }
  0xe4   : > { %s469_s12 = scalar_lea.sflag [#allocation8], %s468_s24 }
  0xe5   : > { %2582 = dma.done.wait (%p3354_p3), %s469_s12, 256  }
  0xe6   : > { %2584 = vsyncadd (%p3354_p3), %s469_s12, 4294967040  ;;  %s481_s11 = scalar_lea.vmem [#allocation9], %s3000_s10  ;;  %p3355_p6 = scmp.eq.s32.totalorder %s2729_s23, 0 }
  0xe8   : > { %2586 = dma.done.wait (%p3355_p6), [#allocation11], 1024   ;;  %p3356_p0 = pmov %p3355_p6 }
  0xea   : > { %2588 = vsyncadd (%p3356_p0), [#allocation11], 4294966272  ;;  %p3357_p4 = pmov %p3356_p0 }
  0xeb   : > { %p3358_p10 = pmov %p3356_p0 }
  0xec   : > { %2590 = dma.done.wait (%p3357_p4), [#allocation14], 528  }
  0xed   : > { %2592 = vsyncadd (%p3358_p10), [#allocation14], 4294966768  ;;  %v2630_v0 = vmov 0.0   ;;  %vm2631_vm0 = vmmov 0   ;;  %v555_v1 = vld [vmem:[#allocation12] sm:$0xff]  ;;  %v556_v2 = vld [vmem:[#allocation12 + $0x8] sm:$0xff]  ;;  %v683_v39 = vlaneseq }
  0xee   : > { %2089 = vmatprep.subr.bf16.mxu0 %v2630_v0  ;;  %2093 = vmatprep.mubr.msk.bf16.mxu0 %vm2631_vm0, %v2630_v0  ;;  %v557_v3 = vld [vmem:[#allocation12 + $0x10] sm:$0xff]  ;;  %v559_v4 = vpack.c.bf16 %v556_v2, %v555_v1  ;;  %v558_v5 = vld [vmem:[#allocation12 + $0x18] sm:$0xff]  ;;  %v551_v7 = vld [vmem:[%s472_s15] sm:$0xff]  ;;  %vm568_vm1 = vcmask 261120   ;;  %s2632_s13 = smov 104   ;;  %s2633_s14 = smov 120  }
  0xef   : > { %2097 = vmatprep.subr.bf16.mxu1 %v2630_v0  ;;  %2101 = vmatprep.mubr.msk.bf16.mxu1 %vm2631_vm0, %v2630_v0  ;;  %v560_v6 = vpack.c.bf16 %v558_v5, %v557_v3  ;;  %v979_v8 = vld [vmem:[#allocation10] sm:$0xff]  ;;  %v980_v9 = vld [vmem:[#allocation10 + $0x8] sm:$0xff]  ;;  %v552_v10 = vpack.c.bf16 %v551_v7, %v551_v7  ;;  %v981_v12 = vld [vmem:[#allocation10 + $0x10] sm:$0xff]  ;;  %s2634_s17 = smov 112   ;;  %v2635_v37 = vmov 1983009808  }
  0xf0   : > { %2090 = vmatpush3.bf16.msra.mxu0 %v559_v4  ;;  %v983_v11 = vpack.c.bf16 %v980_v9, %v979_v8  ;;  %v982_v13 = vld [vmem:[#allocation10 + $0x18] sm:$0xff]  ;;  %v2027_v17 = vld [vmem:[%s3288_s6] ss:$0 sm:$0xff]  ;;  %v612_v25 = vld [vmem:[#allocation13] sm:$0xff]  ;;  %v681_v38 = vunpack.c.l.s4 %v2635_v37  ;;  %v2636_v40 = vmov 1934713408  }
  0xf1   : > { %2091 = vmatprep.subr.bf16.mxu0 %v2630_v0  ;;  %v984_v14 = vpack.c.bf16 %v982_v13, %v981_v12  ;;  %v977_v15 = vld [vmem:[%s463_s7] sm:$0xff]  ;;  %v613_v26 = vld [vmem:[#allocation13 + $0x8] sm:$0xff]  ;;  %v713_v41 = vunpack.c.l.s4 %v2636_v40  ;;  %v684_v43 = vshrl.u32 %v683_v39, 7  ;;  %vm818_vm2 = vcmask 60416   ;;  %s3359_s9 = sld [smem:[#allocation33_spill]]  ;;  %s3360_s7 = sld [smem:[#allocation23_spill]] }
  0xf2   : > { %v978_v16 = vpack.c.bf16 %v977_v15, %v977_v15  ;;  %v2035_v23 = vld [vmem:[%s3286_s4] ss:$0 sm:$0xff]  ;;  %v616_v29 = vpack.c.bf16 %v613_v26, %v612_v25  ;;  %v615_v33 = vld [vmem:[#allocation13 + $0x18] sm:$0xff]  ;;  %v682_v42 = vunpack.c.0.s8 %v681_v38  ;;  %vm1194_vm3 = vcmask 64512   ;;  %s3361_s15 = sld [smem:[#allocation34_spill]]  ;;  %s545_s25 = scalar_lea.vmem [#allocation16], %s3000_s10 }
  0xf3   : > { %v614_v32 = vld [vmem:[#allocation13 + $0x10] sm:$0xff]  ;;  %v714_v46 = vunpack.c.0.s8 %v713_v41  ;;  %vm1434_vm4 = vcmask 1043456   ;;  %s3363_s3 = sld [smem:[#allocation35_spill]]  ;;  %s1829_s30 = scalar_lea.sflag [#allocation6], %s2997_s21 }
  0xf4   : > { %2092 = vmatpush3.bf16.msra.mxu0 %v560_v6  ;;  %2098 = vmatpush3.bf16.msra.mxu1 %v616_v29  ;;  %v617_v34 = vpack.c.bf16 %v615_v33, %v614_v32  ;;  %v553_v35 = vld [vmem:[%s481_s11] sm:$0xff]  ;;  %v3065_v47 = vsub.s32 %v682_v42, %v684_v43  ;;  %s3362_s11 = sld [smem:[#allocation27_spill]]  ;;  %s2637_s10 = smov [#allocation16]  }
  0xf5   : > { %2105 = vmatprep.subr.bf16.mxu0 %v2630_v0  ;;  %2099 = vmatprep.subr.bf16.mxu1 %v2630_v0  ;;  %v554_v36 = vpack.c.bf16 %v553_v35, %v553_v35  ;;  %v3067_v53 = vsub.s32 %v714_v46, %v684_v43  ;;  %s2529_s16 = sshll.u32 %s2637_s10, 4  ;;  %s2530_s16 = int_to_ptr.vmem [resolvable:$false] %s2529_s16 }
  0xf6   : > { %s2531_s29 = scalar_lea.vmem %s2530_s16, 256 }
  0xf7   : > { %2094 = vmatmul.mubr.msk.bf16.vlgmr.msra.gmra.mrb[0].mxu0 %vm568_vm1, %v552_v10  ;;  %s2053_s23 = sshll.u32 %s3360_s7, 7 }
  0xf8   : > { %2106 = vmatpush3.bf16.msra.mxu0 %v983_v11  ;;  %2109 = vmatprep.mubr.msk.bf16.mxu0 %vm2631_vm0, %v2630_v0 }
  0xf9   : > { %2107 = vmatprep.subr.bf16.mxu0 %v2630_v0  ;;  %2100 = vmatpush3.bf16.msra.mxu1 %v617_v34 }
  0xfa   : > { %2113 = vmatprep.subr.bf16.mxu1 %v2630_v0  ;;  %p3364_p2 = scmp.ne.s32.totalorder %s3362_s11, 0 }
  0xfc   : > { %2108 = vmatpush3.bf16.msra.mxu0 %v984_v14  ;;  %2102 = vmatmul.mubr.msk.bf16.vlgmr.msra.gmra.mrb[0].mxu1 %vm568_vm1, %v554_v36 }
  0xfd   : > { %2119 = vmatprep.subr.bf16.mxu0 %v2630_v0  ;;  %2115 = vmatprep.mubr.msk.bf16.mxu1 %vm2631_vm0, %v2630_v0 }
  0xff   : > { %2110 = vmatmul.mubr.msk.bf16.vlgmr.msra.gmra.mrb[4].mxu0 %vm568_vm1, %v978_v16 }
 0x100   : > { %2121 = vmatprep.mubr.msk.bf16.mxu0 %vm2631_vm0, %v2630_v0 }
 0x1ca   : > { %v606_v18 = vpop.f32.mrb[0].mxu0 }
 0x1cb   : > { %v607_v19 = vadd.f32 %v2027_v17, %v606_v18  ;;  %v2095_v20 = vpop.f32.mrb[1].mxu0 }
 0x1cc   : > { %v609_v21 = vpop.f32.mrb[2].mxu0 }
 0x1cd   : > { %675 = vrot.lane.b32.xlu1 %v607_v19, %s2632_s13  ;;  %669 = vrot.lane.b32.xlu0 %v607_v19, %s2633_s14  ;;  %v2096_v22 = vpop.f32.mrb[3].mxu0 }
 0x1d1   : > { %672 = vrot.lane.b32.xlu0 %v607_v19, %s2634_s17 }
 0x1d2   : > { %v1030_v24 = vpop.f32.mrb[4].mxu0 }
 0x1d3   : > { %v3050_v27 = vadd.f32 %v2035_v23, %v1030_v24  ;;  %v2111_v28 = vpop.f32.mrb[5].mxu0 }
 0x1d4   : > { %v1033_v30 = vpop.f32.mrb[6].mxu0 }
 0x1d5   : > { %1040 = vrot.lane.b32.xlu0 %v3050_v27, %s2634_s17  ;;  %1037 = vrot.lane.b32.xlu1 %v3050_v27, %s2633_s14  ;;  %v2112_v31 = vpop.f32.mrb[7].mxu0 }
 0x1d9   : > { %1043 = vrot.lane.b32.xlu1 %v3050_v27, %s2632_s13 }
 0x23f   : > { %v676_v44 = vpop.permute.xlu1 %675  ;;  %v670_v45 = vpop.permute.xlu0 %669 }
 0x240   : > { %v694_v48 = vcombine.low %v670_v45, %v676_v44  ;;  %v695_v49 = vcombine.high %v670_v45, %v676_v44 }
 0x242   : > { %v702_v54 = vrot.slane %v694_v48, %v3065_v47  ;;  %v709_v55 = vrot.slane %v695_v49, %v3065_v47 }
 0x243   : > { %v673_v50 = vpop.permute.xlu0 %672 }
 0x244   : > { %v678_v51 = vcombine.low %v607_v19, %v673_v50  ;;  %v679_v52 = vcombine.high %v607_v19, %v673_v50 }
 0x246   : > { %v686_v56 = vrot.slane %v678_v51, %v3065_v47  ;;  %v693_v57 = vrot.slane %v679_v52, %v3065_v47 }
 0x247   : > { %v1038_v58 = vpop.permute.xlu1 %1037  ;;  %v1041_v63 = vpop.permute.xlu0 %1040 }
 0x248   : > { %v710_v59 = vcombine.low %v686_v56, %v702_v54  ;;  %v711_v60 = vcombine.high %v686_v56, %v702_v54  ;;  %v726_v61 = vcombine.low %v693_v57, %v709_v55  ;;  %v727_v62 = vcombine.high %v693_v57, %v709_v55 }
 0x249   : > { %v1046_v5 = vcombine.low %v3050_v27, %v1041_v63  ;;  %v1047_v6 = vcombine.high %v3050_v27, %v1041_v63 }
 0x24a   : > { %v718_v1 = vrot.slane %v710_v59, %v3067_v53  ;;  %v725_v2 = vrot.slane %v711_v60, %v3067_v53  ;;  %v734_v3 = vrot.slane %v726_v61, %v3067_v53  ;;  %v741_v4 = vrot.slane %v727_v62, %v3067_v53 }
 0x24b   : > { %v1044_v7 = vpop.permute.xlu1 %1043  ;;  %v1054_v18 = vrot.slane %v1046_v5, %v3065_v47  ;;  %v1061_v19 = vrot.slane %v1047_v6, %v3065_v47 }
 0x24c   : > { %v746_v8 = vcombine.low %v718_v1, %v725_v2  ;;  %v2031_v9 = vcombine.high %v718_v1, %v725_v2  ;;  %v762_v10 = vcombine.low %v734_v3, %v741_v4  ;;  %v2032_v11 = vcombine.high %v734_v3, %v741_v4 }
 0x24d   : > { %v1062_v12 = vcombine.low %v1038_v58, %v1044_v7  ;;  %v1063_v13 = vcombine.high %v1038_v58, %v1044_v7 }
 0x24e   : > { %v753_v14 = vrot.slane %v746_v8, %v3065_v47  ;;  %v761_v15 = vrot.slane %v2031_v9, %v3065_v47  ;;  %v769_v16 = vrot.slane %v762_v10, %v3065_v47  ;;  %v777_v17 = vrot.slane %v2032_v11, %v3065_v47 }
 0x24f   : > { %v1070_v20 = vrot.slane %v1062_v12, %v3065_v47  ;;  %v1077_v21 = vrot.slane %v1063_v13, %v3065_v47 }
 0x250   : > { %v778_v22 = vcombine.low %v753_v14, %v761_v15  ;;  %v779_v23 = vcombine.high %v753_v14, %v761_v15  ;;  %v794_v24 = vcombine.low %v769_v16, %v777_v17  ;;  %v795_v25 = vcombine.high %v769_v16, %v777_v17  ;;  %v662_v17 = vpop.f32.mrb[0].mxu1 }
 0x251   : > { %v1078_v26 = vcombine.low %v1054_v18, %v1070_v20  ;;  %v1079_v27 = vcombine.high %v1054_v18, %v1070_v20  ;;  %v1094_v28 = vcombine.low %v1061_v19, %v1077_v21  ;;  %v1095_v29 = vcombine.high %v1061_v19, %v1077_v21  ;;  %v2103_v18 = vpop.f32.mrb[1].mxu1 }
 0x252   : > { %v786_v30 = vrot.slane %v778_v22, %v3067_v53  ;;  %v793_v31 = vrot.slane %v779_v23, %v3067_v53  ;;  %v802_v32 = vrot.slane %v794_v24, %v3067_v53  ;;  %v809_v33 = vrot.slane %v795_v25, %v3067_v53  ;;  %v665_v19 = vpop.f32.mrb[2].mxu1 }
 0x253   : > { %v1086_v34 = vrot.slane %v1078_v26, %v3067_v53  ;;  %v1093_v35 = vrot.slane %v1079_v27, %v3067_v53  ;;  %v1102_v36 = vrot.slane %v1094_v28, %v3067_v53  ;;  %v1109_v37 = vrot.slane %v1095_v29, %v3067_v53  ;;  %v2104_v20 = vpop.f32.mrb[3].mxu1 }
 0x254   : > { %v810_v38 = vcombine.low %v786_v30, %v802_v32  ;;  %v811_v39 = vcombine.high %v786_v30, %v802_v32  ;;  %v812_v40 = vcombine.low %v793_v31, %v809_v33  ;;  %v813_v41 = vcombine.high %v793_v31, %v809_v33 }
 0x255   : > { %v1114_v42 = vcombine.low %v1086_v34, %v1093_v35  ;;  %v2037_v43 = vcombine.high %v1086_v34, %v1093_v35  ;;  %v1130_v44 = vcombine.low %v1102_v36, %v1109_v37  ;;  %v2038_v45 = vcombine.high %v1102_v36, %v1109_v37 }
 0x256   : > { %v814_v46 = vpack.c.bf16 %v810_v38, %v810_v38  ;;  %v815_v48 = vpack.c.bf16 %v811_v39, %v811_v39  ;;  %v816_v49 = vpack.c.bf16 %v812_v40, %v812_v40  ;;  %v817_v50 = vpack.c.bf16 %v813_v41, %v813_v41 }
 0x257   : > { %v1121_v51 = vrot.slane %v1114_v42, %v3065_v47  ;;  %v1129_v52 = vrot.slane %v2037_v43, %v3065_v47  ;;  %v1137_v54 = vrot.slane %v1130_v44, %v3065_v47  ;;  %v1145_v55 = vrot.slane %v2038_v45, %v3065_v47  ;;  %v2029_v45 = vld [vmem:[#allocation15] ss:$0 sm:$0xff] }
 0x258   : > { %819 = vst.msk [vmem:[#allocation2] sm:$0xf] %vm818_vm2, %v814_v46  ;;  %820 = vst.msk [vmem:[#allocation2 + $0x4] sm:$0xf] %vm818_vm2, %v815_v48  ;;  %v663_v46 = vadd.f32 %v2029_v45, %v662_v17 }
 0x259   : > { %821 = vst.msk [vmem:[#allocation2 + $0x8] sm:$0xf] %vm818_vm2, %v816_v49  ;;  %822 = vst.msk [vmem:[#allocation2 + $0xc] sm:$0xf] %vm818_vm2, %v817_v50  ;;  %v1146_v56 = vcombine.low %v1121_v51, %v1129_v52  ;;  %v1162_v57 = vcombine.low %v1137_v54, %v1145_v55  ;;  %v1147_v1 = vcombine.high %v1121_v51, %v1129_v52 }
 0x25a   : > { %v1163_v2 = vcombine.high %v1137_v54, %v1145_v55 }
 0x25b   : > { %v1154_v58 = vrot.slane %v1146_v56, %v3067_v53  ;;  %v1170_v59 = vrot.slane %v1162_v57, %v3067_v53  ;;  %v1161_v9 = vrot.slane %v1147_v1, %v3067_v53 }
 0x25c   : > { %v1177_v10 = vrot.slane %v1163_v2, %v3067_v53 }
 0x25d   : > { %v1178_v3 = vcombine.low %v1154_v58, %v1170_v59  ;;  %v1179_v4 = vcombine.high %v1154_v58, %v1170_v59 }
 0x25e   : > { %v1180_v13 = vcombine.low %v1161_v9, %v1177_v10  ;;  %v1181_v14 = vcombine.high %v1161_v9, %v1177_v10 }
 0x25f   : > { %v1186_v60 = vld [vmem:[#allocation2] sm:$0xf]  ;;  %v1187_v61 = vld [vmem:[#allocation2 + $0x4] sm:$0xf]  ;;  %v1182_v7 = vpack.c.bf16 %v1178_v3, %v1178_v3  ;;  %v1183_v8 = vpack.c.bf16 %v1179_v4, %v1179_v4 }
 0x260   : > { %v1199_v62 = vsel %vm1194_vm3, %v1186_v60, 0  ;;  %v1245_v63 = vsel %vm1194_vm3, %v1187_v61, 0  ;;  %v1188_v5 = vld [vmem:[#allocation2 + $0x8] sm:$0xf]  ;;  %v1189_v6 = vld [vmem:[#allocation2 + $0xc] sm:$0xf]  ;;  %v1184_v15 = vpack.c.bf16 %v1180_v13, %v1180_v13  ;;  %v1185_v16 = vpack.c.bf16 %v1181_v14, %v1181_v14 }
 0x261   : > { %2114 = vmatpush3.bf16.xpose.msra.mxu1 %v1199_v62  ;;  %2120 = vmatpush3.bf16.xpose.msra.mxu0 %v1245_v63  ;;  %v1291_v11 = vsel %vm1194_vm3, %v1188_v5, 0  ;;  %v1337_v12 = vsel %vm1194_vm3, %v1189_v6, 0 }
 0x262   : > { %2125 = vmatprep.subr.bf16.mxu1 %v2630_v0  ;;  %2131 = vmatprep.subr.bf16.mxu0 %v2630_v0 }
 0x268   : > { %2116 = vmatmul.mubr.msk.bf16.vlgmr.msra.gmra.mrb[4].mxu1 %vm1194_vm3, %v1182_v7  ;;  %2122 = vmatmul.mubr.msk.bf16.vlgmr.msra.gmra.mrb[8].mxu0 %vm1194_vm3, %v1183_v8 }
 0x269   : > { %2126 = vmatpush3.bf16.xpose.msra.mxu1 %v1291_v11  ;;  %2132 = vmatpush3.bf16.xpose.msra.mxu0 %v1337_v12 }
 0x26a   : > { %2127 = vmatprep.mubr.msk.bf16.mxu1 %vm2631_vm0, %v2630_v0  ;;  %2133 = vmatprep.mubr.msk.bf16.mxu0 %vm2631_vm0, %v2630_v0 }
 0x26b   : > { %2137 = vmatprep.subr.bf16.mxu1 %v2630_v0  ;;  %2143 = vmatprep.subr.bf16.mxu0 %v2630_v0 }
 0x270   : > { %2128 = vmatmul.mubr.msk.bf16.vlgmr.msra.gmra.mrb[8].mxu1 %vm1194_vm3, %v1184_v15  ;;  %2134 = vmatmul.mubr.msk.bf16.vlgmr.msra.gmra.mrb[12].mxu0 %vm1194_vm3, %v1185_v16 }
 0x271   : > { %2139 = vmatprep.mubr.msk.bf16.mxu1 %vm2631_vm0, %v2630_v0  ;;  %2145 = vmatprep.mubr.msk.bf16.mxu0 %vm2631_vm0, %v2630_v0 }
 0x33b   : > { %v1235_v21 = vpop.f32.mrb[4].mxu1  ;;  %v1281_v22 = vpop.f32.mrb[8].mxu0 }
 0x33c   : > { %v1379_v23 = vmul.f32 0.35355338, %v1235_v21  ;;  %v1380_v24 = vmul.f32 0.35355338, %v1281_v22  ;;  %v2117_v25 = vpop.f32.mrb[5].mxu1  ;;  %v2123_v26 = vpop.f32.mrb[9].mxu0 }
 0x33d   : > { %v1238_v27 = vpop.f32.mrb[6].mxu1  ;;  %v1284_v28 = vpop.f32.mrb[10].mxu0 }
 0x33e   : > { %v2118_v29 = vpop.f32.mrb[7].mxu1  ;;  %v2124_v30 = vpop.f32.mrb[11].mxu0  ;;  %v1383_v31 = vsel %vm1194_vm3, %v1379_v23, -inf  ;;  %v1386_v32 = vsel %vm1194_vm3, %v1380_v24, -inf }
 0x33f   : > { %1384 = vmax.xlane.f32.xlu0 %v1383_v31  ;;  %1387 = vmax.xlane.f32.xlu1 %v1386_v32 }
 0x343   : > { %v1327_v33 = vpop.f32.mrb[8].mxu1  ;;  %v1373_v34 = vpop.f32.mrb[12].mxu0 }
 0x344   : > { %v1381_v35 = vmul.f32 0.35355338, %v1327_v33  ;;  %v2129_v36 = vpop.f32.mrb[9].mxu1  ;;  %v2135_v37 = vpop.f32.mrb[13].mxu0  ;;  %v1382_v40 = vmul.f32 0.35355338, %v1373_v34 }
 0x345   : > { %v1330_v38 = vpop.f32.mrb[10].mxu1  ;;  %v1376_v39 = vpop.f32.mrb[14].mxu0 }
 0x346   : > { %v2130_v41 = vpop.f32.mrb[11].mxu1  ;;  %v2136_v42 = vpop.f32.mrb[15].mxu0  ;;  %v1389_v43 = vsel %vm1194_vm3, %v1381_v35, -inf  ;;  %v1392_v44 = vsel %vm1194_vm3, %v1382_v40, -inf }
 0x347   : > { %1390 = vmax.xlane.f32.xlu0 %v1389_v43 }
 0x34b   : > { %1393 = vmax.xlane.f32.xlu0 %v1392_v44 }
 0x350   : > { %824 = vrot.lane.b32.xlu1 %v663_v46, %s2633_s14 }
 0x354   : > { %830 = vrot.lane.b32.xlu1 %v663_v46, %s2632_s13  ;;  %s1843_s13 = sshll.u32 %s545_s25, 4  ;;  %s3234_s13 = int_to_ptr.vmem [resolvable:$true] %s1843_s13 }
 0x355   : > { %s2525_s26 = scalar_lea.vmem %s3234_s13, 128  ;;  %p2532_p8 = scmp.lt.s32.totalorder %s3234_s13, %s2530_s16 }
 0x356   : > { %p2526_p13 = scmp.ne.s32.totalorder %s3234_s13, %s2525_s26  ;;  %p2533_p9 = scmp.lt.s32.totalorder %s2531_s29, %s2525_s26 }
 0x358   : > { %p2527_p1 = pnand %p2526_p13, %p3364_p2  ;;  %p2534_p7 = por %p2533_p9, %p2532_p8 }
 0x35a   : > { %p2528_p12 = pneg %p2527_p1 }
 0x35c   : > { %p2535_p11 = pnand %p2534_p7, %p2528_p12 }
 0x361   : > { %827 = vrot.lane.b32.xlu0 %v663_v46, %s2634_s17  ;;  %s3232_s17 = scalar_lea.hbm %s3363_s3, %s2053_s23 }
 0x3cc   : > { %v1385_v48 = vpop.xlane.xlu0 %1384  ;;  %v1388_v49 = vpop.xlane.xlu1 %1387 }
 0x3cd   : > { %v1395_v50 = vsub.f32 %v1379_v23, %v1385_v48  ;;  %v1396_v51 = vsub.f32 %v1380_v24, %v1388_v49 }
 0x3cf   : > { %v1399_v52 = vmul.f32 1.442695, %v1395_v50  ;;  %v1401_v54 = vmul.f32 1.442695, %v1396_v51 }
 0x3d0   : > { %v825_v55 = vpop.permute.xlu1 %824 }
 0x3d1   : > { %2307 = vpow2.f32 %v1399_v52 }
 0x3d2   : > { %2309 = vpow2.f32 %v1401_v54 }
 0x3d4   : > { %v1391_v56 = vpop.xlane.xlu0 %1390  ;;  %v831_v59 = vpop.permute.xlu1 %830 }
 0x3d5   : > { %v1397_v57 = vsub.f32 %v1381_v35, %v1391_v56  ;;  %v849_v63 = vcombine.low %v825_v55, %v831_v59  ;;  %v850_v1 = vcombine.high %v825_v55, %v831_v59 }
 0x3d7   : > { %v1403_v58 = vmul.f32 1.442695, %v1397_v57  ;;  %v857_v9 = vrot.slane %v849_v63, %v3065_v47  ;;  %v864_v10 = vrot.slane %v850_v1, %v3065_v47 }
 0x3d8   : > { %v1394_v60 = vpop.xlane.xlu0 %1393 }
 0x3d9   : > { %2311 = vpow2.f32 %v1403_v58  ;;  %v1398_v61 = vsub.f32 %v1382_v40, %v1394_v60 }
 0x3db   : > { %v3134_v62 = vpop.eup %2307  ;;  %v1405_v2 = vmul.f32 1.442695, %v1398_v61 }
 0x3dc   : > { %v3136_v3 = vpop.eup %2309  ;;  %v828_v4 = vpop.permute.xlu0 %827  ;;  %v1407_v5 = vsel %vm1194_vm3, %v3134_v62, 0.0 }
 0x3dd   : > { %2313 = vpow2.f32 %v1405_v2  ;;  %v833_v6 = vcombine.low %v663_v46, %v828_v4  ;;  %v834_v7 = vcombine.high %v663_v46, %v828_v4  ;;  %1408 = vadd.xlane.f32.xlu1 %v1407_v5  ;;  %v1410_v8 = vsel %vm1194_vm3, %v3136_v3, 0.0  ;;  %v1620_v4 = vld [vmem:[%s3359_s9] sm:$0xff] }
 0x3de   : > { %1411 = vadd.xlane.f32.xlu0 %v1410_v8 }
 0x3df   : > { %v841_v11 = vrot.slane %v833_v6, %v3065_v47  ;;  %v848_v12 = vrot.slane %v834_v7, %v3065_v47 }
 0x3e1   : > { %v865_v13 = vcombine.low %v841_v11, %v857_v9  ;;  %v866_v14 = vcombine.high %v841_v11, %v857_v9  ;;  %v881_v15 = vcombine.low %v848_v12, %v864_v10  ;;  %v882_v16 = vcombine.high %v848_v12, %v864_v10 }
 0x3e3   : > { %v3146_v17 = vpop.eup %2311  ;;  %v873_v18 = vrot.slane %v865_v13, %v3067_v53  ;;  %v880_v19 = vrot.slane %v866_v14, %v3067_v53  ;;  %v889_v20 = vrot.slane %v881_v15, %v3067_v53  ;;  %v896_v21 = vrot.slane %v882_v16, %v3067_v53  ;;  %v1621_v13 = vld [vmem:[%s3359_s9 + $0x8] sm:$0xff]  ;;  %v1622_v16 = vld [vmem:[%s3359_s9 + $0x10] sm:$0xff] }
 0x3e4   : > { %v1413_v22 = vsel %vm1194_vm3, %v3146_v17, 0.0  ;;  %v1625_v14 = vpack.c.bf16 %v1621_v13, %v1621_v13 }
 0x3e5   : > { %v901_v23 = vcombine.low %v873_v18, %v880_v19  ;;  %v2033_v24 = vcombine.high %v873_v18, %v880_v19  ;;  %v917_v25 = vcombine.low %v889_v20, %v896_v21  ;;  %v2034_v26 = vcombine.high %v889_v20, %v896_v21  ;;  %1414 = vadd.xlane.f32.xlu0 %v1413_v22 }
 0x3e6   : > { %v1678_v15 = vsel %vm1434_vm4, %v1625_v14, 0  ;;  %v1626_v18 = vpack.c.bf16 %v1622_v16, %v1622_v16 }
 0x3e7   : > { %v3154_v27 = vpop.eup %2313  ;;  %v908_v28 = vrot.slane %v901_v23, %v3065_v47  ;;  %v916_v29 = vrot.slane %v2033_v24, %v3065_v47  ;;  %v924_v30 = vrot.slane %v917_v25, %v3065_v47  ;;  %v932_v31 = vrot.slane %v2034_v26, %v3065_v47 }
 0x3e8   : > { %v1416_v32 = vsel %vm1194_vm3, %v3154_v27, 0.0  ;;  %v1724_v24 = vsel %vm1434_vm4, %v1626_v18, 0 }
 0x3e9   : > { %v933_v33 = vcombine.low %v908_v28, %v916_v29  ;;  %v934_v34 = vcombine.high %v908_v28, %v916_v29  ;;  %v949_v35 = vcombine.low %v924_v30, %v932_v31  ;;  %v950_v36 = vcombine.high %v924_v30, %v932_v31  ;;  %1417 = vadd.xlane.f32.xlu1 %v1416_v32 }
 0x3eb   : > { %v941_v37 = vrot.slane %v933_v33, %v3067_v53  ;;  %v948_v38 = vrot.slane %v934_v34, %v3067_v53  ;;  %v957_v39 = vrot.slane %v949_v35, %v3067_v53  ;;  %v964_v40 = vrot.slane %v950_v36, %v3067_v53 }
 0x3ed   : > { %v965_v41 = vcombine.low %v941_v37, %v957_v39  ;;  %v966_v42 = vcombine.high %v941_v37, %v957_v39  ;;  %v967_v43 = vcombine.low %v948_v38, %v964_v40  ;;  %v968_v47 = vcombine.high %v948_v38, %v964_v40 }
 0x3ef   : > { %v969_v44 = vpack.c.bf16 %v965_v41, %v965_v41  ;;  %v970_v45 = vpack.c.bf16 %v966_v42, %v966_v42  ;;  %v971_v46 = vpack.c.bf16 %v967_v43, %v967_v43  ;;  %v972_v48 = vpack.c.bf16 %v968_v47, %v968_v47 }
 0x3f1   : > { %973 = vst.msk [vmem:[#allocation3] sm:$0xf] %vm818_vm2, %v969_v44  ;;  %974 = vst.msk [vmem:[#allocation3 + $0x4] sm:$0xf] %vm818_vm2, %v970_v45 }
 0x3f2   : > { %975 = vst.msk [vmem:[#allocation3 + $0x8] sm:$0xf] %vm818_vm2, %v971_v46  ;;  %976 = vst.msk [vmem:[#allocation3 + $0xc] sm:$0xf] %vm818_vm2, %v972_v48 }
 0x3f8   : > { %v1190_v49 = vld [vmem:[#allocation3] sm:$0xf]  ;;  %v1191_v50 = vld [vmem:[#allocation3 + $0x4] sm:$0xf] }
 0x3f9   : > { %v1436_v53 = vsel %vm1434_vm4, %v1190_v49, 0  ;;  %v1482_v51 = vsel %vm1434_vm4, %v1191_v50, 0  ;;  %v1192_v61 = vld [vmem:[#allocation3 + $0x8] sm:$0xf]  ;;  %v1193_v1 = vld [vmem:[#allocation3 + $0xc] sm:$0xf] }
 0x3fa   : > { %2138 = vmatpush3.bf16.msra.mxu1 %v1436_v53  ;;  %2144 = vmatpush3.bf16.msra.mxu0 %v1482_v51  ;;  %v1528_v5 = vsel %vm1434_vm4, %v1192_v61, 0 }
 0x3fb   : > { %2149 = vmatprep.subr.bf16.mxu1 %v2630_v0  ;;  %2155 = vmatprep.subr.bf16.mxu0 %v2630_v0 }
 0x46a   : > { %v1409_v52 = vpop.xlane.xlu1 %1408 }
 0x46b   : > { %2315 = vrcp.f32 %v1409_v52  ;;  %v1412_v54 = vpop.xlane.xlu0 %1411 }
 0x46c   : > { %2317 = vrcp.f32 %v1412_v54 }
 0x472   : > { %v1415_v55 = vpop.xlane.xlu0 %1414 }
 0x473   : > { %2319 = vrcp.f32 %v1415_v55 }
 0x475   : > { %v2316_v56 = vpop.eup %2315 }
 0x476   : > { %v2318_v57 = vpop.eup %2317  ;;  %v1423_v58 = vmul.f32 %v2316_v56, %v3134_v62  ;;  %v1418_v59 = vpop.xlane.xlu1 %1417  ;;  %v1574_v62 = vsel %vm1434_vm4, %v1193_v1, 0 }
 0x477   : > { %v1424_v60 = vmul.f32 %v2318_v57, %v3136_v3  ;;  %2321 = vrcp.f32 %v1418_v59  ;;  %v1624_v3 = vpack.c.bf16 %v1620_v4, %v1620_v4 }
 0x478   : > { %v1427_v63 = vpack.c.bf16 %v1423_v58, %v1423_v58 }
 0x479   : > { %v1428_v2 = vpack.c.bf16 %v1424_v60, %v1424_v60  ;;  %v1632_v9 = vsel %vm1434_vm4, %v1624_v3, 0  ;;  %v2051_v60 = vld [vmem:[%s3361_s15] ss:$0 sm:$0xff] }
 0x47a   : > { %2140 = vmatmul.mubr.msk.bf16.vlgmr.msra.gmra.mrb[12].mxu1 %vm1194_vm3, %v1427_v63 }
 0x47b   : > { %2146 = vmatmul.mubr.msk.bf16.vlgmr.msra.gmra.mrb[16].mxu0 %vm1194_vm3, %v1428_v2  ;;  %2150 = vmatpush3.bf16.msra.mxu1 %v1528_v5 }
 0x47c   : > { %2156 = vmatpush3.bf16.msra.mxu0 %v1574_v62  ;;  %2151 = vmatprep.mubr.msk.bf16.mxu1 %vm2631_vm0, %v2630_v0 }
 0x47d   : > { %v2320_v6 = vpop.eup %2319  ;;  %2157 = vmatprep.mubr.msk.bf16.mxu0 %vm2631_vm0, %v2630_v0  ;;  %2161 = vmatprep.subr.bf16.mxu1 %v2630_v0 }
 0x47e   : > { %v1425_v7 = vmul.f32 %v2320_v6, %v3146_v17  ;;  %2167 = vmatprep.subr.bf16.mxu0 %v2630_v0  ;;  %v1623_v17 = vld [vmem:[%s3359_s9 + $0x18] sm:$0xff] }
 0x47f   : > { %v1627_v19 = vpack.c.bf16 %v1623_v17, %v1623_v17 }
 0x480   : > { %v1429_v8 = vpack.c.bf16 %v1425_v7, %v1425_v7 }
 0x481   : > { %v2322_v10 = vpop.eup %2321  ;;  %v1770_v28 = vsel %vm1434_vm4, %v1627_v19, 0 }
 0x482   : > { %v1426_v11 = vmul.f32 %v2322_v10, %v3154_v27  ;;  %2152 = vmatmul.mubr.msk.bf16.vlgmr.msra.gmra.mrb[16].mxu1 %vm1194_vm3, %v1429_v8 }
 0x483   : > { %2162 = vmatpush3.bf16.msra.mxu1 %v1632_v9  ;;  %2163 = vmatprep.mubr.msk.bf16.mxu1 %vm2631_vm0, %v2630_v0 }
 0x484   : > { %v1430_v12 = vpack.c.bf16 %v1426_v11, %v1426_v11  ;;  %2173 = vmatprep.subr.bf16.mxu1 %v2630_v0 }
 0x486   : > { %2158 = vmatmul.mubr.msk.bf16.vlgmr.msra.gmra.mrb[20].mxu0 %vm1194_vm3, %v1430_v12 }
 0x487   : > { %2169 = vmatprep.mubr.msk.bf16.mxu0 %vm2631_vm0, %v2630_v0  ;;  %2168 = vmatpush3.bf16.msra.mxu0 %v1678_v15 }
 0x488   : > { %2179 = vmatprep.subr.bf16.mxu0 %v2630_v0 }
 0x54d   : > { %v1472_v20 = vpop.f32.mrb[12].mxu1 }
 0x54e   : > { %v1616_v21 = vpack.c.bf16 %v1472_v20, %v1472_v20  ;;  %v1518_v22 = vpop.f32.mrb[16].mxu0  ;;  %v2141_v23 = vpop.f32.mrb[13].mxu1 }
 0x54f   : > { %v1617_v25 = vpack.c.bf16 %v1518_v22, %v1518_v22  ;;  %v2147_v26 = vpop.f32.mrb[17].mxu0  ;;  %v1475_v27 = vpop.f32.mrb[14].mxu1 }
 0x550   : > { %v1521_v29 = vpop.f32.mrb[18].mxu0  ;;  %v2142_v30 = vpop.f32.mrb[15].mxu1  ;;  %2164 = vmatmul.mubr.msk.bf16.vlgmr.msra.gmra.mrb[20].mxu1 %vm1194_vm3, %v1616_v21 }
 0x551   : > { %v2148_v31 = vpop.f32.mrb[19].mxu0  ;;  %2170 = vmatmul.mubr.msk.bf16.vlgmr.msra.gmra.mrb[24].mxu0 %vm1194_vm3, %v1617_v25  ;;  %2174 = vmatpush3.bf16.msra.mxu1 %v1724_v24 }
 0x552   : > { %2180 = vmatpush3.bf16.msra.mxu0 %v1770_v28  ;;  %2175 = vmatprep.mubr.msk.bf16.mxu1 %vm2631_vm0, %v2630_v0 }
 0x553   : > { %2181 = vmatprep.mubr.msk.bf16.mxu0 %vm2631_vm0, %v2630_v0 }
 0x555   : > { %v1564_v32 = vpop.f32.mrb[16].mxu1 }
 0x556   : > { %v1618_v33 = vpack.c.bf16 %v1564_v32, %v1564_v32  ;;  %v2153_v34 = vpop.f32.mrb[17].mxu1 }
 0x557   : > { %v1567_v35 = vpop.f32.mrb[18].mxu1 }
 0x558   : > { %v2154_v36 = vpop.f32.mrb[19].mxu1  ;;  %2176 = vmatmul.mubr.msk.bf16.vlgmr.msra.gmra.mrb[24].mxu1 %vm1194_vm3, %v1618_v33 }
 0x559   : > { %v1610_v37 = vpop.f32.mrb[20].mxu0 }
 0x55a   : > { %v1619_v38 = vpack.c.bf16 %v1610_v37, %v1610_v37  ;;  %v2159_v39 = vpop.f32.mrb[21].mxu0 }
 0x55b   : > { %v1613_v40 = vpop.f32.mrb[22].mxu0 }
 0x55c   : > { %v2160_v41 = vpop.f32.mrb[23].mxu0  ;;  %2182 = vmatmul.mubr.msk.bf16.vlgmr.msra.gmra.mrb[28].mxu0 %vm1194_vm3, %v1619_v38 }
 0x623   : > { %v1668_v42 = vpop.f32.mrb[20].mxu1 }
 0x624   : > { %v1812_v43 = vsel %vm568_vm1, %v1668_v42, 0.0  ;;  %v1714_v47 = vpop.f32.mrb[24].mxu0  ;;  %v2165_v44 = vpop.f32.mrb[21].mxu1 }
 0x625   : > { %v1813_v0 = vsel %vm568_vm1, %v1714_v47, 0.0  ;;  %v2171_v45 = vpop.f32.mrb[25].mxu0  ;;  %v1671_v46 = vpop.f32.mrb[22].mxu1 }
 0x626   : > { %v1814_v48 = vadd.f32 %v1813_v0, %v1812_v43  ;;  %v1717_v49 = vpop.f32.mrb[26].mxu0  ;;  %v2166_v50 = vpop.f32.mrb[23].mxu1 }
 0x627   : > { %v2172_v53 = vpop.f32.mrb[27].mxu0 }
 0x62b   : > { %v1760_v51 = vpop.f32.mrb[24].mxu1 }
 0x62c   : > { %v1815_v52 = vsel %vm568_vm1, %v1760_v51, 0.0  ;;  %v2177_v54 = vpop.f32.mrb[25].mxu1 }
 0x62d   : > { %v1816_v55 = vadd.f32 %v1815_v52, %v1814_v48  ;;  %v1763_v56 = vpop.f32.mrb[26].mxu1 }
 0x62e   : > { %v2178_v57 = vpop.f32.mrb[27].mxu1 }
 0x62f   : > { %v1806_v58 = vpop.f32.mrb[28].mxu0 }
 0x630   : > { %v1817_v59 = vsel %vm568_vm1, %v1806_v58, 0.0  ;;  %v2183_v61 = vpop.f32.mrb[29].mxu0 }
 0x631   : > { %v1818_v63 = vadd.f32 %v1817_v59, %v1816_v55  ;;  %v1809_v1 = vpop.f32.mrb[30].mxu0 }
 0x632   : > { %v2184_v2 = vpop.f32.mrb[31].mxu0 }
 0x633   : > { %v1826_v4 = vadd.f32 %v2051_v60, %v1818_v63 }
 0x635   : > { %1827 = vst.msk [vmem:[%s545_s25] sm:$0xff] %vm568_vm1, %v1826_v4 }
 0x636   : > { %2538 = shalt.err (!%p2535_p11)
}
 0x637   : > { %s2539_s21 = scalar_lea.hbm %s3232_s17, 128  ;;  %s2543_s1 = scalar_lea.hbm %s3363_s3, 256 }
 0x638   : > { %p2540_p5 = scmp.ne.s32.totalorder %s3232_s17, %s2539_s21  ;;  %p2544_p0 = scmp.lt.u32.totalorder %s3232_s17, %s3363_s3 }
 0x639   : > { %p2545_p4 = scmp.lt.u32.totalorder %s2543_s1, %s2539_s21  ;;  %p2547_p13 = scmp.lt.u32.totalorder %s2539_s21, %s3232_s17 }
 0x63a   : > { %p2541_p3 = pnand %p2540_p5, %p3364_p2 }
 0x63b   : > { %p2546_p10 = por %p2545_p4, %p2544_p0 }
 0x63c   : > { %p2542_p6 = pneg %p2541_p3 }
 0x63d   : > { %p2548_p1 = por %p2547_p13, %p2546_p10 }
 0x63f   : > { %p2549_p12 = pnand %p2548_p1, %p2542_p6 }
 0x641   : > { %2552 = shalt.err (!%p2549_p12)
}
 0x642   : > { %2207 = dma.vmem_to_hbm [thread:$0]  (%p3364_p2), %s3234_s13, 128, %s3232_s17, %s1829_s30  }
 0x643 PF: > { %s3365_s24 = sld [smem:[#allocation22_spill]]  ;;  %s3366_s12 = sld [smem:[#allocation29_spill]] }
 0x644   : > { %s3367_s15 = sld [smem:[#allocation25_spill]] }
 0x649   : > { %s1855_s23 = sand.u32 1, %s3365_s24   ;;  %p3368_p8 = scmp.ne.s32.totalorder %s3366_s12, 0 }
 0x64a   : > { %p3369_p9 = scmp.ge.s32.totalorder %s3367_s15, 2  ;;  %s1856_s25 = scalar_lea.sflag [#allocation6], %s1855_s23 }
 0x64c   : > { %p2233_p7 = pnand %p3369_p9, %p3368_p8 }
 0x64e   : > { %2594 = dma.done.wait (!%p2233_p7), %s1856_s25, 128  }
 0x64f   : > { %2596 = vsyncadd (!%p2233_p7), %s1856_s25, 4294967168  ;;  %s32_s22 = sadd.s32 1, %s3367_s15   ;;  %s3370_s11 = sld [smem:[#allocation28_spill]] }
 0x650   : > { %p29_p11 = scmp.ge.s32.totalorder %s32_s22, 4   ;;  %s3371_s20 = sld [smem:[#allocation24_spill]] }
 0x651   : > { %s3372_s21 = sld [smem:[#allocation26_spill]]  ;;  %s3373_s17 = smov %s2603_s18 }
 0x652   : > { %s3374_s18 = smov %s2607_s19  ;;  %31 = sbr.rel (!%p29_p11) target bundleno = 17 (0x11), region = 153 }
 0x655   : > { %s3375_s19 = smov %s3370_s11 }
 0x659   :  { %1861 = vsyncpa [#allocation5], 1 }
 0x65a   :  { %1863 = vsyncpa [#allocation5 + $0x1], 1 }
 0x65b   :  { %1864 = vsyncpa [#allocation8], 1 }
 0x65c   :  { %1866 = vsyncpa [#allocation8 + $0x1], 1 }
 0x65d   :  { %1867 = vsyncpa [#allocation11], 1 }
 0x65e   :  { %1868 = vsyncpa [#allocation14], 1 }
 0x65f   :  { %1869 = vsyncpa [#allocation6], 1 }
 0x660   :  { %1871 = vsyncpa [#allocation6 + $0x1], 1 }

// kernel: tpu_custom_call.1
= control target key start
LH: loop header
LB: loop body
LE: loop exit
PB: predicated region body
PF: predicated region fallthrough
CT: control target
= control target key end

     0   :  { %s3282_s0 = inlined_call_operand.hbm [shape: f32[2,8,32], index: 0, kind: input, shape index: {}]   ;;  %s3283_s1 = inlined_call_operand.hbm [shape: f32[2,8,32], index: 1, kind: input, shape index: {}]   ;;  %s3284_s2 = inlined_call_operand.hbm [shape: f32[2,8,32], index: 2, kind: input, shape index: {}]   ;;  %s3285_s3 = inlined_call_operand.hbm [shape: f32[32,32], index: 3, kind: input, shape index: {}]   ;;  %s3286_s4 = inlined_call_operand.vmem [shape: f32[1,32], index: 4, kind: input, shape index: {}]   ;;  %s3287_s5 = inlined_call_operand.hbm [shape: f32[32,32], index: 5, kind: input, shape index: {}]   ;;  %s3288_s6 = inlined_call_operand.vmem [shape: f32[1,32], index: 6, kind: input, shape index: {}]   ;;  %s3289_s7 = inlined_call_operand.hbm [shape: f32[32,32], index: 7, kind: input, shape index: {}]   ;;  %s3290_s8 = inlined_call_operand.hbm [shape: f32[1,32], index: 8, kind: input, shape index: {}]   ;;  %s3291_s9 = inlined_call_operand.vmem [shape: f32[4,8,32], index: 9, kind: input, shape index: {}]   ;;  %s3292_s10 = inlined_call_operand.vmem [shape: f32[1,32], index: 10, kind: input, shape index: {}]   ;;  %s3293_s11 = inlined_call_operand.hbm [shape: f32[2,8,32], index: 11, kind: output, shape index: {}]  }
   0x1   :  { %3319 = sst [smem:[#allocation30_spill]] %s3283_s1 }
   0x2   :  { %3320 = sst [smem:[#allocation31_spill]] %s3285_s3 }
   0x3   :  { %3321 = sst [smem:[#allocation32_spill]] %s3289_s7 }
   0x4   :  { %3322 = sst [smem:[#allocation33_spill]] %s3291_s9 }
   0x5   :  { %3323 = sst [smem:[#allocation34_spill]] %s3292_s10 }
   0x6   :  { %3324 = sst [smem:[#allocation35_spill]] %s3293_s11 }
   0x7   :  { %16 = vsyncpa [#allocation5], 0 }
   0x8   :  { %18 = vsyncpa [#allocation5 + $0x1], 0 }
   0x9   :  { %19 = vsyncpa [#allocation8], 0 }
   0xa   :  { %21 = vsyncpa [#allocation8 + $0x1], 0 }
   0xb   :  { %22 = vsyncpa [#allocation11], 0 }
   0xc   :  { %23 = vsyncpa [#allocation14], 0 }
   0xd   :  { %24 = vsyncpa [#allocation6], 0 }
   0xe   :  { %26 = vsyncpa [#allocation6 + $0x1], 0  ;;  %s2698_s17 = smov 0   ;;  %s2700_s18 = smov 0  }
   0xf   :  { %s2702_s19 = smov 0   ;;  %s2704_s20 = smov 0  }
  0x10   :  { %s2706_s21 = smov 0   ;;  %s2708_s22 = smov 0  }
  0x11 LB: > { %3325 = sst [smem:[#allocation22_spill]] %s2599_s17  ;;  %s2729_s23 = sadd.s32 4294967295, %s2619_s22   ;;  %s2619_s22 = sphi %s2708_s22, %s32_s22   ;;  %s2615_s21 = sphi %s2706_s21, %s3372_s21   ;;  %s2611_s20 = sphi %s2704_s20, %s3371_s20   ;;  %s2607_s19 = sphi %s2702_s19, %s3375_s19   ;;  %s2603_s18 = sphi %s2700_s18, %s3374_s18   ;;  %s2599_s17 = sphi %s2698_s17, %s3373_s17  }
  0x12   : > { %3326 = sst [smem:[#allocation23_spill]] %s2611_s20  ;;  %p2006_p0 = scmp.ge.s32.totalorder %s2619_s22, 1 }
  0x13   : > { %3327 = sst [smem:[#allocation24_spill]] %s2615_s21  ;;  %p3303_p1 = scmp.eq.s32.totalorder %s2729_s23, 0 }
  0x14   : > { %3328 = sst [smem:[#allocation25_spill]] %s2619_s22  ;;  %p325_p2 = scmp.lt.s32.totalorder %s2619_s22, 3 }
  0x15   : > { %s2621_s25 = smov [#allocation10]   ;;  %s2622_s28 = smov [#allocation13]  }
  0x16   : > { %p2734_p3 = pnand %p2006_p0, %p325_p2  ;;  %s337_s26 = sshll.u32 %s2621_s25, 4  ;;  %s2738_s26 = int_to_ptr.vmem [resolvable:$true] %s337_s26 }
  0x17   : > { %s369_s29 = sshll.u32 %s2622_s28, 4  ;;  %s3331_s3 = sld [smem:[#allocation31_spill]]  ;;  %s2749_s29 = int_to_ptr.vmem [resolvable:$true] %s369_s29 }
  0x18   : > { %s3329_s24 = scalar_select %p2734_p3, 1, 0 }
  0x19   : > { %p2209_p4 = pneg %p2734_p3 }
  0x1b   : > { %p2745_p6 = pnand %p2209_p4, %p3303_p1 }
  0x1d   : > { %s3330_s27 = scalar_select %p2745_p6, 1, 0 }
  0x1e   : > { %s2323_s13 = scalar_lea.hbm %s3331_s3, 512  ;;  %p2759_p8 = pneg %p2745_p6 }
  0x1f   : > { %p2324_p7 = scmp.ne.s32.totalorder %s3331_s3, %s2323_s13  ;;  %p2330_p11 = scmp.lt.u32.totalorder %s2323_s13, %s3331_s3 }
  0x20   : > { %s3332_s16 = scalar_select %p2759_p8, 1, 0 }
  0x21   : > { %p2326_p9 = pnand %p2759_p8, %p2324_p7 }
  0x23   : > { %p2327_p10 = pneg %p2326_p9 }
  0x25   : > { %p2332_p12 = pnand %p2330_p11, %p2327_p10 }
  0x27   : > { %2335 = shalt.err (!%p2332_p12)
}
  0x28   : > { %s2336_s30 = scalar_lea.vmem %s2738_s26, 512  ;;  %p2344_p4 = scmp.lt.s32.totalorder %s2738_s26, %s2738_s26 }
  0x29   : > { %p2337_p13 = scmp.ne.s32.totalorder %s2738_s26, %s2336_s30  ;;  %p2345_p5 = scmp.lt.s32.totalorder %s2336_s30, %s2336_s30 }
  0x2b   : > { %p2339_p0 = pnand %p2337_p13, %p2759_p8  ;;  %p2346_p7 = por %p2345_p5, %p2344_p4 }
  0x2d   : > { %p2340_p2 = pneg %p2339_p0 }
  0x2f   : > { %p2347_p9 = pnand %p2346_p7, %p2340_p2 }
  0x31   : > { %2350 = shalt.err (!%p2347_p9)
}
  0x32   : > { %s3296_s12 = smov 128   ;;  %s3297_s13 = smov 8  }
  0x33   : > { %2212 = dma.hbm_to_vmem [thread:$0]  (!%p2745_p6), %s3331_s3, 512, %s2738_s26, [#allocation11], %s3296_s12, %s3296_s12, %s3297_s13  }
  0x34   : > { %s3333_s7 = sld [smem:[#allocation32_spill]] }
  0x3a   : > { %s2351_s30 = scalar_lea.hbm %s3333_s7, 512 }
  0x3b   : > { %p2352_p5 = scmp.ne.s32.totalorder %s3333_s7, %s2351_s30  ;;  %p2358_p12 = scmp.lt.u32.totalorder %s2351_s30, %s3333_s7 }
  0x3d   : > { %p2354_p10 = pnand %p2352_p5, %p2759_p8 }
  0x3f   : > { %p2355_p11 = pneg %p2354_p10 }
  0x41   : > { %p2360_p13 = pnand %p2358_p12, %p2355_p11 }
  0x43   : > { %2363 = shalt.err (!%p2360_p13)
}
  0x44   : > { %s2364_s26 = scalar_lea.vmem %s2749_s29, 512  ;;  %p2372_p7 = scmp.lt.s32.totalorder %s2749_s29, %s2749_s29 }
  0x45   : > { %p2365_p0 = scmp.ne.s32.totalorder %s2749_s29, %s2364_s26  ;;  %p2373_p9 = scmp.lt.s32.totalorder %s2364_s26, %s2364_s26 }
  0x47   : > { %p2367_p2 = pnand %p2365_p0, %p2759_p8  ;;  %p2374_p5 = por %p2373_p9, %p2372_p7 }
  0x49   : > { %p2368_p4 = pneg %p2367_p2 }
  0x4b   : > { %p2375_p10 = pnand %p2374_p5, %p2368_p4 }
  0x4d   : > { %2378 = shalt.err (!%p2375_p10)
}
  0x4e   : > { %2218 = dma.hbm_to_vmem [thread:$0]  (!%p2745_p6), %s3333_s7, 512, %s2749_s29, [#allocation14], %s3296_s12, %s3296_s12, %s3297_s13  }
  0x4f   : > { %s2005_s11 = sadd.s32 4294967294, %s2619_s22   ;;  %s44_s20 = sadd.s32 1, %s2615_s21 }
  0x50   : > { %p46_p11 = scmp.ge.s32.totalorder %s44_s20, 2  ;;  %s53_s14 = sadd.s32 1, %s2607_s19 }
  0x51   : > { %p60_p12 = scmp.ne.s32.totalorder %s2607_s19, %s2603_s18  ;;  %p61_p13 = scmp.eq.s32.totalorder %s2619_s22, 0 }
  0x52   : > { %s3377_s20 = smov (%p46_p11, %s44_s20), 0  ;;  %p66_p2 = scmp.ne.s32.totalorder %s2603_s18, %s2599_s17 }
  0x53   : > { %3334 = sst [smem:[#allocation26_spill]] %s3377_s20  ;;  %p2817_p0 = por %p61_p13, %p60_p12 }
  0x54   : > { %s48_s29 = ssub.s32 %s2615_s21, %s3377_s20  ;;  %p312_p4 = scmp.eq.s32.totalorder %s2729_s23, 1 }
  0x55   : > { %p51_p7 = scmp.eq.s32.totalorder %s48_s29, 0  ;;  %p2828_p9 = por %p3303_p1, %p66_p2 }
  0x56   : > { %p2832_p5 = por %p312_p4, %p60_p12  ;;  %p318_p10 = scmp.eq.s32.totalorder %s2005_s11, 1 }
  0x57   : > { %s3336_s25 = scalar_select %p2828_p9, 1, 0 }
  0x58   : > { %s3337_s28 = scalar_select %p2832_p5, 1, 0 }
  0x59   : > { %s2837_s30 = scalar_select %p51_p7, %s2607_s19, %s53_s14  }
  0x5a   : > { %3338 = sst [smem:[#allocation27_spill]] %s3337_s28  ;;  %p2839_p11 = por %p318_p10, %p66_p2 }
  0x5b   : > { %3339 = sst [smem:[#allocation28_spill]] %s2837_s30  ;;  %p2240_p13 = scmp.lt.s32.totalorder %s2619_s22, 2 }
  0x5c   : > { %s3340_s26 = scalar_select %p2839_p11, 1, 0 }
  0x5d   : > { %s3298_s9 = sand.u32 1, %s2607_s19   ;;  %s2846_s10 = sshll.u32 %s2615_s21, 7 }
  0x5e   : > { %3341 = sst [smem:[#allocation29_spill]] %s3340_s26  ;;  %s2850_s29 = sshll.u32 %s3298_s9, 3 }
  0x5f   : > { %p2854_p12 = pnand %p2240_p13, %p2817_p0  ;;  %s419_s11 = sand.u32 1, %s2619_s22  }
  0x60   : > { %s3343_s1 = sld [smem:[#allocation30_spill]]  ;;  %s423_s7 = scalar_lea.vmem [#allocation7], %s2850_s29 }
  0x61   : > { %s3342_s12 = scalar_select %p2854_p12, 1, 0 }
  0x62   : > { %s430_s9 = sshll.u32 %s423_s7, 4  ;;  %s2868_s15 = scalar_lea.sflag [#allocation8], %s419_s11  ;;  %s2866_s9 = int_to_ptr.vmem [resolvable:$true] %s430_s9 }
  0x63   : > { %p2874_p2 = pneg %p2854_p12 }
  0x65   : > { %s3344_s21 = scalar_select %p2874_p2, 1, 0 }
  0x66   : > { %s2863_s3 = scalar_lea.hbm %s3343_s1, %s2846_s10  ;;  %s2384_s30 = scalar_lea.hbm %s3343_s1, 256 }
  0x67   : > { %s2379_s20 = scalar_lea.hbm %s2863_s3, 128  ;;  %p2385_p10 = scmp.lt.u32.totalorder %s2863_s3, %s3343_s1 }
  0x68   : > { %p2380_p0 = scmp.ne.s32.totalorder %s2863_s3, %s2379_s20  ;;  %p2386_p13 = scmp.lt.u32.totalorder %s2384_s30, %s2379_s20 }
  0x69   : > { %p2388_p11 = scmp.lt.u32.totalorder %s2379_s20, %s2863_s3 }
  0x6a   : > { %p2382_p4 = pnand %p2874_p2, %p2380_p0  ;;  %p2387_p1 = por %p2386_p13, %p2385_p10 }
  0x6c   : > { %p2383_p7 = pneg %p2382_p4  ;;  %p2389_p5 = por %p2388_p11, %p2387_p1 }
  0x6e   : > { %p2390_p9 = pnand %p2389_p5, %p2383_p7 }
  0x70   : > { %2393 = shalt.err (!%p2390_p9)
}
  0x71   : > { %s2394_s11 = scalar_lea.vmem %s2866_s9, 128  ;;  %s2625_s13 = smov [#allocation7]  }
  0x72   : > { %p2395_p0 = scmp.ne.s32.totalorder %s2866_s9, %s2394_s11  ;;  %s2399_s14 = sshll.u32 %s2625_s13, 4  ;;  %s2400_s14 = int_to_ptr.vmem [resolvable:$false] %s2399_s14 }
  0x73   : > { %s2401_s22 = scalar_lea.vmem %s2400_s14, 256  ;;  %p2402_p6 = scmp.lt.s32.totalorder %s2866_s9, %s2400_s14 }
  0x74   : > { %p2397_p4 = pnand %p2395_p0, %p2874_p2  ;;  %p2403_p8 = scmp.lt.s32.totalorder %s2401_s22, %s2394_s11 }
  0x76   : > { %p2398_p3 = pneg %p2397_p4  ;;  %p2404_p10 = por %p2403_p8, %p2402_p6 }
  0x78   : > { %p2405_p13 = pnand %p2404_p10, %p2398_p3 }
  0x7a   : > { %2408 = shalt.err (!%p2405_p13)
}
  0x7b   : > { %2228 = dma.hbm_to_vmem [thread:$0]  (!%p2854_p12), %s2863_s3, 128, %s2866_s9, %s2868_s15  }
  0x7c   : > { %s2626_s20 = smov [#allocation12]   ;;  %s2627_s7 = smov [#allocation15]  }
  0x7d   : > { %s353_s30 = sshll.u32 %s2626_s20, 4  ;;  %s383_s1 = sshll.u32 %s2627_s7, 4  ;;  %s354_s30 = int_to_ptr.vmem [resolvable:$true] %s353_s30  ;;  %s384_s1 = int_to_ptr.vmem [resolvable:$true] %s383_s1 }
  0x7e   : > { %s2409_s14 = scalar_lea.hbm %s3287_s5, 512  ;;  %p3345_p3 = scmp.ne.s32.totalorder %s3332_s16, 0 }
  0x7f   : > { %p2410_p1 = scmp.ne.s32.totalorder %s3287_s5, %s2409_s14  ;;  %p2416_p9 = scmp.lt.u32.totalorder %s2409_s14, %s3287_s5 }
  0x81   : > { %p2412_p6 = pnand %p2410_p1, %p3345_p3 }
  0x83   : > { %p2413_p8 = pneg %p2412_p6 }
  0x85   : > { %p2418_p5 = pnand %p2416_p9, %p2413_p8 }
  0x87   : > { %2421 = shalt.err (!%p2418_p5)
}
  0x88   : > { %s2422_s3 = scalar_lea.vmem %s354_s30, 512  ;;  %p2430_p4 = scmp.lt.s32.totalorder %s354_s30, %s354_s30 }
  0x89   : > { %p2423_p11 = scmp.ne.s32.totalorder %s354_s30, %s2422_s3  ;;  %p2431_p10 = scmp.lt.s32.totalorder %s2422_s3, %s2422_s3 }
  0x8b   : > { %p2425_p7 = pnand %p2423_p11, %p3345_p3  ;;  %p2432_p13 = por %p2431_p10, %p2430_p4 }
  0x8d   : > { %p2426_p0 = pneg %p2425_p7 }
  0x8f   : > { %p2433_p12 = pnand %p2432_p13, %p2426_p0 }
  0x91   : > { %2436 = shalt.err (!%p2433_p12)
}
  0x92   : > { %p3346_p1 = scmp.ne.s32.totalorder %s3330_s27, 0  ;;  %s3347_s26 = smov 8  }
  0x93   : > { %s3348_s9 = smov 128   ;;  %s2437_s13 = scalar_lea.hbm %s3290_s8, 16 }
  0x94   : > { %2215 = dma.hbm_to_vmem [thread:$0]  (!%p3346_p1), %s3287_s5, 512, %s354_s30, [#allocation11], %s3348_s9, %s3348_s9, %s3347_s26  }
  0x95   : > { %p2438_p6 = scmp.ne.s32.totalorder %s3290_s8, %s2437_s13  ;;  %p2444_p9 = scmp.lt.u32.totalorder %s2437_s13, %s3290_s8 }
  0x97   : > { %p2440_p12 = pnand %p2438_p6, %p3345_p3 }
  0x99   : > { %p2441_p8 = pneg %p2440_p12 }
  0x9b   : > { %p2446_p5 = pnand %p2444_p9, %p2441_p8 }
  0x9d   : > { %2449 = shalt.err (!%p2446_p5)
}
  0x9e   : > { %s2450_s17 = scalar_lea.vmem %s384_s1, 16  ;;  %s2457_s30 = scalar_lea.vmem %s384_s1, 32 }
  0x9f   : > { %p2451_p11 = scmp.ne.s32.totalorder %s384_s1, %s2450_s17  ;;  %p2458_p4 = scmp.lt.s32.totalorder %s384_s1, %s384_s1 }
  0xa0   : > { %p2459_p10 = scmp.lt.s32.totalorder %s2457_s30, %s2450_s17 }
  0xa1   : > { %p2453_p7 = pnand %p2451_p11, %p3345_p3 }
  0xa2   : > { %p2460_p13 = por %p2459_p10, %p2458_p4 }
  0xa3   : > { %p2454_p0 = pneg %p2453_p7 }
  0xa5   : > { %p2461_p2 = pnand %p2460_p13, %p2454_p0 }
  0xa7   : > { %2464 = shalt.err (!%p2461_p2)
}
  0xa8   : > { %2221 = dma.hbm_to_vmem [thread:$0]  (!%p3346_p1), %s3290_s8, 16, %s384_s1, [#allocation14]  }
  0xa9   : > { %s2941_s20 = scalar_lea.hbm %s3282_s0, %s2846_s10  ;;  %s404_s7 = scalar_lea.vmem [#allocation4], %s2850_s29 }
  0xaa   : > { %s412_s27 = sshll.u32 %s404_s7, 4  ;;  %s2950_s11 = scalar_lea.hbm %s3284_s2, %s2846_s10  ;;  %s2944_s27 = int_to_ptr.vmem [resolvable:$true] %s412_s27 }
  0xab   : > { %s3349_s22 = sand.u32 1, %s2607_s19   ;;  %s2465_s3 = scalar_lea.hbm %s2941_s20, 128 }
  0xac   : > { %s401_s1 = scalar_lea.sflag [#allocation5], %s3349_s22  ;;  %p2466_p2 = scmp.ne.s32.totalorder %s2941_s20, %s2465_s3 }
  0xad   : > { %p3350_p3 = scmp.ne.s32.totalorder %s3344_s21, 0  ;;  %s2470_s26 = scalar_lea.hbm %s3282_s0, 256 }
  0xae   : > { %p2471_p12 = scmp.lt.u32.totalorder %s2941_s20, %s3282_s0  ;;  %p2472_p8 = scmp.lt.u32.totalorder %s2470_s26, %s2465_s3 }
  0xaf   : > { %p2468_p1 = pnand %p2466_p2, %p3350_p3  ;;  %p2474_p5 = scmp.lt.u32.totalorder %s2465_s3, %s2941_s20 }
  0xb0   : > { %p2473_p9 = por %p2472_p8, %p2471_p12 }
  0xb1   : > { %p2469_p6 = pneg %p2468_p1 }
  0xb2   : > { %p2475_p11 = por %p2474_p5, %p2473_p9 }
  0xb4   : > { %p2476_p7 = pnand %p2475_p11, %p2469_p6 }
  0xb6   : > { %2479 = shalt.err (!%p2476_p7)
}
  0xb7   : > { %s2480_s10 = scalar_lea.vmem %s2944_s27, 128  ;;  %s2628_s28 = smov [#allocation4]  }
  0xb8   : > { %p2481_p0 = scmp.ne.s32.totalorder %s2944_s27, %s2480_s10  ;;  %s2485_s7 = sshll.u32 %s2628_s28, 4  ;;  %s2486_s7 = int_to_ptr.vmem [resolvable:$false] %s2485_s7 }
  0xb9   : > { %s2487_s13 = scalar_lea.vmem %s2486_s7, 256  ;;  %p2488_p13 = scmp.lt.s32.totalorder %s2944_s27, %s2486_s7 }
  0xba   : > { %p2483_p4 = pnand %p2481_p0, %p3350_p3  ;;  %p2489_p2 = scmp.lt.s32.totalorder %s2487_s13, %s2480_s10 }
  0xbc   : > { %p2484_p10 = pneg %p2483_p4  ;;  %p2490_p1 = por %p2489_p2, %p2488_p13 }
  0xbe   : > { %p2491_p12 = pnand %p2490_p1, %p2484_p10 }
  0xc0   : > { %2494 = shalt.err (!%p2491_p12)
}
  0xc1   : > { %p3351_p6 = scmp.ne.s32.totalorder %s3342_s12, 0  ;;  %s441_s14 = scalar_lea.vmem [#allocation9], %s2850_s29 }
  0xc2   : > { %s448_s22 = sshll.u32 %s441_s14, 4  ;;  %s2495_s3 = scalar_lea.hbm %s2950_s11, 128  ;;  %s449_s22 = int_to_ptr.vmem [resolvable:$true] %s448_s22 }
  0xc3   : > { %2225 = dma.hbm_to_vmem [thread:$0]  (!%p3351_p6), %s2941_s20, 128, %s2944_s27, %s401_s1  }
  0xc4   : > { %p2496_p8 = scmp.ne.s32.totalorder %s2950_s11, %s2495_s3  ;;  %s2500_s26 = scalar_lea.hbm %s3284_s2, 256 }
  0xc5   : > { %p2501_p11 = scmp.lt.u32.totalorder %s2950_s11, %s3284_s2  ;;  %p2502_p7 = scmp.lt.u32.totalorder %s2500_s26, %s2495_s3 }
  0xc6   : > { %p2498_p9 = pnand %p2496_p8, %p3350_p3  ;;  %p2504_p4 = scmp.lt.u32.totalorder %s2495_s3, %s2950_s11 }
  0xc7   : > { %p2503_p0 = por %p2502_p7, %p2501_p11 }
  0xc8   : > { %p2499_p5 = pneg %p2498_p9 }
  0xc9   : > { %p2505_p10 = por %p2504_p4, %p2503_p0 }
  0xcb   : > { %p2506_p13 = pnand %p2505_p10, %p2499_p5 }
  0xcd   : > { %2509 = shalt.err (!%p2506_p13)
}
  0xce   : > { %s2510_s29 = scalar_lea.vmem %s449_s22, 128  ;;  %s2629_s20 = smov [#allocation9]  }
  0xcf   : > { %p2511_p2 = scmp.ne.s32.totalorder %s449_s22, %s2510_s29  ;;  %s2515_s27 = sshll.u32 %s2629_s20, 4  ;;  %s2516_s27 = int_to_ptr.vmem [resolvable:$false] %s2515_s27 }
  0xd0   : > { %s2517_s1 = scalar_lea.vmem %s2516_s27, 256  ;;  %p2518_p8 = scmp.lt.s32.totalorder %s449_s22, %s2516_s27 }
  0xd1   : > { %p2513_p1 = pnand %p2511_p2, %p3350_p3  ;;  %p2519_p9 = scmp.lt.s32.totalorder %s2517_s1, %s2510_s29 }
  0xd3   : > { %p2514_p12 = pneg %p2513_p1  ;;  %p2520_p6 = por %p2519_p9, %p2518_p8 }
  0xd5   : > { %p2521_p7 = pnand %p2520_p6, %p2514_p12 }
  0xd7   : > { %2524 = shalt.err (!%p2521_p7)
}
  0xd8   : > { %p3352_p11 = scmp.ne.s32.totalorder %s3342_s12, 0  ;;  %p3353_p5 = scmp.ne.s32.totalorder %s3329_s24, 0 }
  0xd9   : > { %s2997_s21 = sand.u32 (!%p3353_p5), 1, %s2603_s18   ;;  %p3354_p3 = scmp.ne.s32.totalorder (!%p3353_p5), %s3336_s25, 0 }
  0xda   : > { %2231 = dma.hbm_to_vmem [thread:$0]  (!%p3352_p11), %s2950_s11, 128, %s449_s22, %s2868_s15  }
  0xdb   : > { %457 = sbr.rel (%p3353_p5) target bundleno = 1603 (0x643), region = 64  ;;  %s3000_s10 = sshll.u32 (!%p3353_p5), %s2997_s21, 3 }
  0xdc   : > { %s460_s28 = scalar_lea.sflag (!%p3353_p5), [#allocation5], %s2997_s21  ;;  %s463_s7 = scalar_lea.vmem (!%p3353_p5), [#allocation4], %s3000_s10 }
  0xe2   : > { %2578 = dma.done.wait (%p3354_p3), %s460_s28, 128  }
  0xe3   : > { %2580 = vsyncadd (%p3354_p3), %s460_s28, 4294967168  ;;  %s468_s24 = sand.u32 1, %s2729_s23   ;;  %s472_s15 = scalar_lea.vmem [#allocation7], %s3000_s10 }
  0xe4   : > { %s469_s12 = scalar_lea.sflag [#allocation8], %s468_s24 }
  0xe5   : > { %2582 = dma.done.wait (%p3354_p3), %s469_s12, 256  }
  0xe6   : > { %2584 = vsyncadd (%p3354_p3), %s469_s12, 4294967040  ;;  %s481_s11 = scalar_lea.vmem [#allocation9], %s3000_s10  ;;  %p3355_p6 = scmp.eq.s32.totalorder %s2729_s23, 0 }
  0xe8   : > { %2586 = dma.done.wait (%p3355_p6), [#allocation11], 1024   ;;  %p3356_p0 = pmov %p3355_p6 }
  0xea   : > { %2588 = vsyncadd (%p3356_p0), [#allocation11], 4294966272  ;;  %p3357_p4 = pmov %p3356_p0 }
  0xeb   : > { %p3358_p10 = pmov %p3356_p0 }
  0xec   : > { %2590 = dma.done.wait (%p3357_p4), [#allocation14], 528  }
  0xed   : > { %2592 = vsyncadd (%p3358_p10), [#allocation14], 4294966768  ;;  %v2630_v0 = vmov 0.0   ;;  %vm2631_vm0 = vmmov 0   ;;  %v555_v1 = vld [vmem:[#allocation12] sm:$0xff]  ;;  %v556_v2 = vld [vmem:[#allocation12 + $0x8] sm:$0xff]  ;;  %v683_v39 = vlaneseq }
  0xee   : > { %2089 = vmatprep.subr.bf16.mxu0 %v2630_v0  ;;  %2093 = vmatprep.mubr.msk.bf16.mxu0 %vm2631_vm0, %v2630_v0  ;;  %v557_v3 = vld [vmem:[#allocation12 + $0x10] sm:$0xff]  ;;  %v559_v4 = vpack.c.bf16 %v556_v2, %v555_v1  ;;  %v558_v5 = vld [vmem:[#allocation12 + $0x18] sm:$0xff]  ;;  %v551_v7 = vld [vmem:[%s472_s15] sm:$0xff]  ;;  %vm568_vm1 = vcmask 261120   ;;  %s2632_s13 = smov 104   ;;  %s2633_s14 = smov 120  }
  0xef   : > { %2097 = vmatprep.subr.bf16.mxu1 %v2630_v0  ;;  %2101 = vmatprep.mubr.msk.bf16.mxu1 %vm2631_vm0, %v2630_v0  ;;  %v560_v6 = vpack.c.bf16 %v558_v5, %v557_v3  ;;  %v979_v8 = vld [vmem:[#allocation10] sm:$0xff]  ;;  %v980_v9 = vld [vmem:[#allocation10 + $0x8] sm:$0xff]  ;;  %v552_v10 = vpack.c.bf16 %v551_v7, %v551_v7  ;;  %v981_v12 = vld [vmem:[#allocation10 + $0x10] sm:$0xff]  ;;  %s2634_s17 = smov 112   ;;  %v2635_v37 = vmov 1983009808  }
  0xf0   : > { %2090 = vmatpush3.bf16.msra.mxu0 %v559_v4  ;;  %v983_v11 = vpack.c.bf16 %v980_v9, %v979_v8  ;;  %v982_v13 = vld [vmem:[#allocation10 + $0x18] sm:$0xff]  ;;  %v2027_v17 = vld [vmem:[%s3288_s6] ss:$0 sm:$0xff]  ;;  %v612_v25 = vld [vmem:[#allocation13] sm:$0xff]  ;;  %v681_v38 = vunpack.c.l.s4 %v2635_v37  ;;  %v2636_v40 = vmov 1934713408  }
  0xf1   : > { %2091 = vmatprep.subr.bf16.mxu0 %v2630_v0  ;;  %v984_v14 = vpack.c.bf16 %v982_v13, %v981_v12  ;;  %v977_v15 = vld [vmem:[%s463_s7] sm:$0xff]  ;;  %v613_v26 = vld [vmem:[#allocation13 + $0x8] sm:$0xff]  ;;  %v713_v41 = vunpack.c.l.s4 %v2636_v40  ;;  %v684_v43 = vshrl.u32 %v683_v39, 7  ;;  %vm818_vm2 = vcmask 60416   ;;  %s3359_s9 = sld [smem:[#allocation33_spill]]  ;;  %s3360_s7 = sld [smem:[#allocation23_spill]] }
  0xf2   : > { %v978_v16 = vpack.c.bf16 %v977_v15, %v977_v15  ;;  %v2035_v23 = vld [vmem:[%s3286_s4] ss:$0 sm:$0xff]  ;;  %v616_v29 = vpack.c.bf16 %v613_v26, %v612_v25  ;;  %v615_v33 = vld [vmem:[#allocation13 + $0x18] sm:$0xff]  ;;  %v682_v42 = vunpack.c.0.s8 %v681_v38  ;;  %vm1194_vm3 = vcmask 64512   ;;  %s3361_s15 = sld [smem:[#allocation34_spill]]  ;;  %s545_s25 = scalar_lea.vmem [#allocation16], %s3000_s10 }
  0xf3   : > { %v614_v32 = vld [vmem:[#allocation13 + $0x10] sm:$0xff]  ;;  %v714_v46 = vunpack.c.0.s8 %v713_v41  ;;  %vm1434_vm4 = vcmask 1043456   ;;  %s3363_s3 = sld [smem:[#allocation35_spill]]  ;;  %s1829_s30 = scalar_lea.sflag [#allocation6], %s2997_s21 }
  0xf4   : > { %2092 = vmatpush3.bf16.msra.mxu0 %v560_v6  ;;  %2098 = vmatpush3.bf16.msra.mxu1 %v616_v29  ;;  %v617_v34 = vpack.c.bf16 %v615_v33, %v614_v32  ;;  %v553_v35 = vld [vmem:[%s481_s11] sm:$0xff]  ;;  %v3065_v47 = vsub.s32 %v682_v42, %v684_v43  ;;  %s3362_s11 = sld [smem:[#allocation27_spill]]  ;;  %s2637_s10 = smov [#allocation16]  }
  0xf5   : > { %2105 = vmatprep.subr.bf16.mxu0 %v2630_v0  ;;  %2099 = vmatprep.subr.bf16.mxu1 %v2630_v0  ;;  %v554_v36 = vpack.c.bf16 %v553_v35, %v553_v35  ;;  %v3067_v53 = vsub.s32 %v714_v46, %v684_v43  ;;  %s2529_s16 = sshll.u32 %s2637_s10, 4  ;;  %s2530_s16 = int_to_ptr.vmem [resolvable:$false] %s2529_s16 }
  0xf6   : > { %s2531_s29 = scalar_lea.vmem %s2530_s16, 256 }
  0xf7   : > { %2094 = vmatmul.mubr.msk.bf16.vlgmr.msra.gmra.mrb[0].mxu0 %vm568_vm1, %v552_v10  ;;  %s2053_s23 = sshll.u32 %s3360_s7, 7 }
  0xf8   : > { %2106 = vmatpush3.bf16.msra.mxu0 %v983_v11  ;;  %2109 = vmatprep.mubr.msk.bf16.mxu0 %vm2631_vm0, %v2630_v0 }
  0xf9   : > { %2107 = vmatprep.subr.bf16.mxu0 %v2630_v0  ;;  %2100 = vmatpush3.bf16.msra.mxu1 %v617_v34 }
  0xfa   : > { %2113 = vmatprep.subr.bf16.mxu1 %v2630_v0  ;;  %p3364_p2 = scmp.ne.s32.totalorder %s3362_s11, 0 }
  0xfc   : > { %2108 = vmatpush3.bf16.msra.mxu0 %v984_v14  ;;  %2102 = vmatmul.mubr.msk.bf16.vlgmr.msra.gmra.mrb[0].mxu1 %vm568_vm1, %v554_v36 }
  0xfd   : > { %2119 = vmatprep.subr.bf16.mxu0 %v2630_v0  ;;  %2115 = vmatprep.mubr.msk.bf16.mxu1 %vm2631_vm0, %v2630_v0 }
  0xff   : > { %2110 = vmatmul.mubr.msk.bf16.vlgmr.msra.gmra.mrb[4].mxu0 %vm568_vm1, %v978_v16 }
 0x100   : > { %2121 = vmatprep.mubr.msk.bf16.mxu0 %vm2631_vm0, %v2630_v0 }
 0x1ca   : > { %v606_v18 = vpop.f32.mrb[0].mxu0 }
 0x1cb   : > { %v607_v19 = vadd.f32 %v2027_v17, %v606_v18  ;;  %v2095_v20 = vpop.f32.mrb[1].mxu0 }
 0x1cc   : > { %v609_v21 = vpop.f32.mrb[2].mxu0 }
 0x1cd   : > { %675 = vrot.lane.b32.xlu1 %v607_v19, %s2632_s13  ;;  %669 = vrot.lane.b32.xlu0 %v607_v19, %s2633_s14  ;;  %v2096_v22 = vpop.f32.mrb[3].mxu0 }
 0x1d1   : > { %672 = vrot.lane.b32.xlu0 %v607_v19, %s2634_s17 }
 0x1d2   : > { %v1030_v24 = vpop.f32.mrb[4].mxu0 }
 0x1d3   : > { %v3050_v27 = vadd.f32 %v2035_v23, %v1030_v24  ;;  %v2111_v28 = vpop.f32.mrb[5].mxu0 }
 0x1d4   : > { %v1033_v30 = vpop.f32.mrb[6].mxu0 }
 0x1d5   : > { %1040 = vrot.lane.b32.xlu0 %v3050_v27, %s2634_s17  ;;  %1037 = vrot.lane.b32.xlu1 %v3050_v27, %s2633_s14  ;;  %v2112_v31 = vpop.f32.mrb[7].mxu0 }
 0x1d9   : > { %1043 = vrot.lane.b32.xlu1 %v3050_v27, %s2632_s13 }
 0x23f   : > { %v676_v44 = vpop.permute.xlu1 %675  ;;  %v670_v45 = vpop.permute.xlu0 %669 }
 0x240   : > { %v694_v48 = vcombine.low %v670_v45, %v676_v44  ;;  %v695_v49 = vcombine.high %v670_v45, %v676_v44 }
 0x242   : > { %v702_v54 = vrot.slane %v694_v48, %v3065_v47  ;;  %v709_v55 = vrot.slane %v695_v49, %v3065_v47 }
 0x243   : > { %v673_v50 = vpop.permute.xlu0 %672 }
 0x244   : > { %v678_v51 = vcombine.low %v607_v19, %v673_v50  ;;  %v679_v52 = vcombine.high %v607_v19, %v673_v50 }
 0x246   : > { %v686_v56 = vrot.slane %v678_v51, %v3065_v47  ;;  %v693_v57 = vrot.slane %v679_v52, %v3065_v47 }
 0x247   : > { %v1038_v58 = vpop.permute.xlu1 %1037  ;;  %v1041_v63 = vpop.permute.xlu0 %1040 }
 0x248   : > { %v710_v59 = vcombine.low %v686_v56, %v702_v54  ;;  %v711_v60 = vcombine.high %v686_v56, %v702_v54  ;;  %v726_v61 = vcombine.low %v693_v57, %v709_v55  ;;  %v727_v62 = vcombine.high %v693_v57, %v709_v55 }
 0x249   : > { %v1046_v5 = vcombine.low %v3050_v27, %v1041_v63  ;;  %v1047_v6 = vcombine.high %v3050_v27, %v1041_v63 }
 0x24a   : > { %v718_v1 = vrot.slane %v710_v59, %v3067_v53  ;;  %v725_v2 = vrot.slane %v711_v60, %v3067_v53  ;;  %v734_v3 = vrot.slane %v726_v61, %v3067_v53  ;;  %v741_v4 = vrot.slane %v727_v62, %v3067_v53 }
 0x24b   : > { %v1044_v7 = vpop.permute.xlu1 %1043  ;;  %v1054_v18 = vrot.slane %v1046_v5, %v3065_v47  ;;  %v1061_v19 = vrot.slane %v1047_v6, %v3065_v47 }
 0x24c   : > { %v746_v8 = vcombine.low %v718_v1, %v725_v2  ;;  %v2031_v9 = vcombine.high %v718_v1, %v725_v2  ;;  %v762_v10 = vcombine.low %v734_v3, %v741_v4  ;;  %v2032_v11 = vcombine.high %v734_v3, %v741_v4 }
 0x24d   : > { %v1062_v12 = vcombine.low %v1038_v58, %v1044_v7  ;;  %v1063_v13 = vcombine.high %v1038_v58, %v1044_v7 }
 0x24e   : > { %v753_v14 = vrot.slane %v746_v8, %v3065_v47  ;;  %v761_v15 = vrot.slane %v2031_v9, %v3065_v47  ;;  %v769_v16 = vrot.slane %v762_v10, %v3065_v47  ;;  %v777_v17 = vrot.slane %v2032_v11, %v3065_v47 }
 0x24f   : > { %v1070_v20 = vrot.slane %v1062_v12, %v3065_v47  ;;  %v1077_v21 = vrot.slane %v1063_v13, %v3065_v47 }
 0x250   : > { %v778_v22 = vcombine.low %v753_v14, %v761_v15  ;;  %v779_v23 = vcombine.high %v753_v14, %v761_v15  ;;  %v794_v24 = vcombine.low %v769_v16, %v777_v17  ;;  %v795_v25 = vcombine.high %v769_v16, %v777_v17  ;;  %v662_v17 = vpop.f32.mrb[0].mxu1 }
 0x251   : > { %v1078_v26 = vcombine.low %v1054_v18, %v1070_v20  ;;  %v1079_v27 = vcombine.high %v1054_v18, %v1070_v20  ;;  %v1094_v28 = vcombine.low %v1061_v19, %v1077_v21  ;;  %v1095_v29 = vcombine.high %v1061_v19, %v1077_v21  ;;  %v2103_v18 = vpop.f32.mrb[1].mxu1 }
 0x252   : > { %v786_v30 = vrot.slane %v778_v22, %v3067_v53  ;;  %v793_v31 = vrot.slane %v779_v23, %v3067_v53  ;;  %v802_v32 = vrot.slane %v794_v24, %v3067_v53  ;;  %v809_v33 = vrot.slane %v795_v25, %v3067_v53  ;;  %v665_v19 = vpop.f32.mrb[2].mxu1 }
 0x253   : > { %v1086_v34 = vrot.slane %v1078_v26, %v3067_v53  ;;  %v1093_v35 = vrot.slane %v1079_v27, %v3067_v53  ;;  %v1102_v36 = vrot.slane %v1094_v28, %v3067_v53  ;;  %v1109_v37 = vrot.slane %v1095_v29, %v3067_v53  ;;  %v2104_v20 = vpop.f32.mrb[3].mxu1 }
 0x254   : > { %v810_v38 = vcombine.low %v786_v30, %v802_v32  ;;  %v811_v39 = vcombine.high %v786_v30, %v802_v32  ;;  %v812_v40 = vcombine.low %v793_v31, %v809_v33  ;;  %v813_v41 = vcombine.high %v793_v31, %v809_v33 }
 0x255   : > { %v1114_v42 = vcombine.low %v1086_v34, %v1093_v35  ;;  %v2037_v43 = vcombine.high %v1086_v34, %v1093_v35  ;;  %v1130_v44 = vcombine.low %v1102_v36, %v1109_v37  ;;  %v2038_v45 = vcombine.high %v1102_v36, %v1109_v37 }
 0x256   : > { %v814_v46 = vpack.c.bf16 %v810_v38, %v810_v38  ;;  %v815_v48 = vpack.c.bf16 %v811_v39, %v811_v39  ;;  %v816_v49 = vpack.c.bf16 %v812_v40, %v812_v40  ;;  %v817_v50 = vpack.c.bf16 %v813_v41, %v813_v41 }
 0x257   : > { %v1121_v51 = vrot.slane %v1114_v42, %v3065_v47  ;;  %v1129_v52 = vrot.slane %v2037_v43, %v3065_v47  ;;  %v1137_v54 = vrot.slane %v1130_v44, %v3065_v47  ;;  %v1145_v55 = vrot.slane %v2038_v45, %v3065_v47  ;;  %v2029_v45 = vld [vmem:[#allocation15] ss:$0 sm:$0xff] }
 0x258   : > { %819 = vst.msk [vmem:[#allocation2] sm:$0xf] %vm818_vm2, %v814_v46  ;;  %820 = vst.msk [vmem:[#allocation2 + $0x4] sm:$0xf] %vm818_vm2, %v815_v48  ;;  %v663_v46 = vadd.f32 %v2029_v45, %v662_v17 }
 0x259   : > { %821 = vst.msk [vmem:[#allocation2 + $0x8] sm:$0xf] %vm818_vm2, %v816_v49  ;;  %822 = vst.msk [vmem:[#allocation2 + $0xc] sm:$0xf] %vm818_vm2, %v817_v50  ;;  %v1146_v56 = vcombine.low %v1121_v51, %v1129_v52  ;;  %v1162_v57 = vcombine.low %v1137_v54, %v1145_v55  ;;  %v1147_v1 = vcombine.high %v1121_v51, %v1129_v52 }
 0x25a   : > { %v1163_v2 = vcombine.high %v1137_v54, %v1145_v55 }
 0x25b   : > { %v1154_v58 = vrot.slane %v1146_v56, %v3067_v53  ;;  %v1170_v59 = vrot.slane %v1162_v57, %v3067_v53  ;;  %v1161_v9 = vrot.slane %v1147_v1, %v3067_v53 }
 0x25c   : > { %v1177_v10 = vrot.slane %v1163_v2, %v3067_v53 }
 0x25d   : > { %v1178_v3 = vcombine.low %v1154_v58, %v1170_v59  ;;  %v1179_v4 = vcombine.high %v1154_v58, %v1170_v59 }
 0x25e   : > { %v1180_v13 = vcombine.low %v1161_v9, %v1177_v10  ;;  %v1181_v14 = vcombine.high %v1161_v9, %v1177_v10 }
 0x25f   : > { %v1186_v60 = vld [vmem:[#allocation2] sm:$0xf]  ;;  %v1187_v61 = vld [vmem:[#allocation2 + $0x4] sm:$0xf]  ;;  %v1182_v7 = vpack.c.bf16 %v1178_v3, %v1178_v3  ;;  %v1183_v8 = vpack.c.bf16 %v1179_v4, %v1179_v4 }
 0x260   : > { %v1199_v62 = vsel %vm1194_vm3, %v1186_v60, 0  ;;  %v1245_v63 = vsel %vm1194_vm3, %v1187_v61, 0  ;;  %v1188_v5 = vld [vmem:[#allocation2 + $0x8] sm:$0xf]  ;;  %v1189_v6 = vld [vmem:[#allocation2 + $0xc] sm:$0xf]  ;;  %v1184_v15 = vpack.c.bf16 %v1180_v13, %v1180_v13  ;;  %v1185_v16 = vpack.c.bf16 %v1181_v14, %v1181_v14 }
 0x261   : > { %2114 = vmatpush3.bf16.xpose.msra.mxu1 %v1199_v62  ;;  %2120 = vmatpush3.bf16.xpose.msra.mxu0 %v1245_v63  ;;  %v1291_v11 = vsel %vm1194_vm3, %v1188_v5, 0  ;;  %v1337_v12 = vsel %vm1194_vm3, %v1189_v6, 0 }
 0x262   : > { %2125 = vmatprep.subr.bf16.mxu1 %v2630_v0  ;;  %2131 = vmatprep.subr.bf16.mxu0 %v2630_v0 }
 0x268   : > { %2116 = vmatmul.mubr.msk.bf16.vlgmr.msra.gmra.mrb[4].mxu1 %vm1194_vm3, %v1182_v7  ;;  %2122 = vmatmul.mubr.msk.bf16.vlgmr.msra.gmra.mrb[8].mxu0 %vm1194_vm3, %v1183_v8 }
 0x269   : > { %2126 = vmatpush3.bf16.xpose.msra.mxu1 %v1291_v11  ;;  %2132 = vmatpush3.bf16.xpose.msra.mxu0 %v1337_v12 }
 0x26a   : > { %2127 = vmatprep.mubr.msk.bf16.mxu1 %vm2631_vm0, %v2630_v0  ;;  %2133 = vmatprep.mubr.msk.bf16.mxu0 %vm2631_vm0, %v2630_v0 }
 0x26b   : > { %2137 = vmatprep.subr.bf16.mxu1 %v2630_v0  ;;  %2143 = vmatprep.subr.bf16.mxu0 %v2630_v0 }
 0x270   : > { %2128 = vmatmul.mubr.msk.bf16.vlgmr.msra.gmra.mrb[8].mxu1 %vm1194_vm3, %v1184_v15  ;;  %2134 = vmatmul.mubr.msk.bf16.vlgmr.msra.gmra.mrb[12].mxu0 %vm1194_vm3, %v1185_v16 }
 0x271   : > { %2139 = vmatprep.mubr.msk.bf16.mxu1 %vm2631_vm0, %v2630_v0  ;;  %2145 = vmatprep.mubr.msk.bf16.mxu0 %vm2631_vm0, %v2630_v0 }
 0x33b   : > { %v1235_v21 = vpop.f32.mrb[4].mxu1  ;;  %v1281_v22 = vpop.f32.mrb[8].mxu0 }
 0x33c   : > { %v1379_v23 = vmul.f32 0.35355338, %v1235_v21  ;;  %v1380_v24 = vmul.f32 0.35355338, %v1281_v22  ;;  %v2117_v25 = vpop.f32.mrb[5].mxu1  ;;  %v2123_v26 = vpop.f32.mrb[9].mxu0 }
 0x33d   : > { %v1238_v27 = vpop.f32.mrb[6].mxu1  ;;  %v1284_v28 = vpop.f32.mrb[10].mxu0 }
 0x33e   : > { %v2118_v29 = vpop.f32.mrb[7].mxu1  ;;  %v2124_v30 = vpop.f32.mrb[11].mxu0  ;;  %v1383_v31 = vsel %vm1194_vm3, %v1379_v23, -inf  ;;  %v1386_v32 = vsel %vm1194_vm3, %v1380_v24, -inf }
 0x33f   : > { %1384 = vmax.xlane.f32.xlu0 %v1383_v31  ;;  %1387 = vmax.xlane.f32.xlu1 %v1386_v32 }
 0x343   : > { %v1327_v33 = vpop.f32.mrb[8].mxu1  ;;  %v1373_v34 = vpop.f32.mrb[12].mxu0 }
 0x344   : > { %v1381_v35 = vmul.f32 0.35355338, %v1327_v33  ;;  %v2129_v36 = vpop.f32.mrb[9].mxu1  ;;  %v2135_v37 = vpop.f32.mrb[13].mxu0  ;;  %v1382_v40 = vmul.f32 0.35355338, %v1373_v34 }
 0x345   : > { %v1330_v38 = vpop.f32.mrb[10].mxu1  ;;  %v1376_v39 = vpop.f32.mrb[14].mxu0 }
 0x346   : > { %v2130_v41 = vpop.f32.mrb[11].mxu1  ;;  %v2136_v42 = vpop.f32.mrb[15].mxu0  ;;  %v1389_v43 = vsel %vm1194_vm3, %v1381_v35, -inf  ;;  %v1392_v44 = vsel %vm1194_vm3, %v1382_v40, -inf }
 0x347   : > { %1390 = vmax.xlane.f32.xlu0 %v1389_v43 }
 0x34b   : > { %1393 = vmax.xlane.f32.xlu0 %v1392_v44 }
 0x350   : > { %824 = vrot.lane.b32.xlu1 %v663_v46, %s2633_s14 }
 0x354   : > { %830 = vrot.lane.b32.xlu1 %v663_v46, %s2632_s13  ;;  %s1843_s13 = sshll.u32 %s545_s25, 4  ;;  %s3234_s13 = int_to_ptr.vmem [resolvable:$true] %s1843_s13 }
 0x355   : > { %s2525_s26 = scalar_lea.vmem %s3234_s13, 128  ;;  %p2532_p8 = scmp.lt.s32.totalorder %s3234_s13, %s2530_s16 }
 0x356   : > { %p2526_p13 = scmp.ne.s32.totalorder %s3234_s13, %s2525_s26  ;;  %p2533_p9 = scmp.lt.s32.totalorder %s2531_s29, %s2525_s26 }
 0x358   : > { %p2527_p1 = pnand %p2526_p13, %p3364_p2  ;;  %p2534_p7 = por %p2533_p9, %p2532_p8 }
 0x35a   : > { %p2528_p12 = pneg %p2527_p1 }
 0x35c   : > { %p2535_p11 = pnand %p2534_p7, %p2528_p12 }
 0x361   : > { %827 = vrot.lane.b32.xlu0 %v663_v46, %s2634_s17  ;;  %s3232_s17 = scalar_lea.hbm %s3363_s3, %s2053_s23 }
 0x3cc   : > { %v1385_v48 = vpop.xlane.xlu0 %1384  ;;  %v1388_v49 = vpop.xlane.xlu1 %1387 }
 0x3cd   : > { %v1395_v50 = vsub.f32 %v1379_v23, %v1385_v48  ;;  %v1396_v51 = vsub.f32 %v1380_v24, %v1388_v49 }
 0x3cf   : > { %v1399_v52 = vmul.f32 1.442695, %v1395_v50  ;;  %v1401_v54 = vmul.f32 1.442695, %v1396_v51 }
 0x3d0   : > { %v825_v55 = vpop.permute.xlu1 %824 }
 0x3d1   : > { %2307 = vpow2.f32 %v1399_v52 }
 0x3d2   : > { %2309 = vpow2.f32 %v1401_v54 }
 0x3d4   : > { %v1391_v56 = vpop.xlane.xlu0 %1390  ;;  %v831_v59 = vpop.permute.xlu1 %830 }
 0x3d5   : > { %v1397_v57 = vsub.f32 %v1381_v35, %v1391_v56  ;;  %v849_v63 = vcombine.low %v825_v55, %v831_v59  ;;  %v850_v1 = vcombine.high %v825_v55, %v831_v59 }
 0x3d7   : > { %v1403_v58 = vmul.f32 1.442695, %v1397_v57  ;;  %v857_v9 = vrot.slane %v849_v63, %v3065_v47  ;;  %v864_v10 = vrot.slane %v850_v1, %v3065_v47 }
 0x3d8   : > { %v1394_v60 = vpop.xlane.xlu0 %1393 }
 0x3d9   : > { %2311 = vpow2.f32 %v1403_v58  ;;  %v1398_v61 = vsub.f32 %v1382_v40, %v1394_v60 }
 0x3db   : > { %v3134_v62 = vpop.eup %2307  ;;  %v1405_v2 = vmul.f32 1.442695, %v1398_v61 }
 0x3dc   : > { %v3136_v3 = vpop.eup %2309  ;;  %v828_v4 = vpop.permute.xlu0 %827  ;;  %v1407_v5 = vsel %vm1194_vm3, %v3134_v62, 0.0 }
 0x3dd   : > { %2313 = vpow2.f32 %v1405_v2  ;;  %v833_v6 = vcombine.low %v663_v46, %v828_v4  ;;  %v834_v7 = vcombine.high %v663_v46, %v828_v4  ;;  %1408 = vadd.xlane.f32.xlu1 %v1407_v5  ;;  %v1410_v8 = vsel %vm1194_vm3, %v3136_v3, 0.0  ;;  %v1620_v4 = vld [vmem:[%s3359_s9] sm:$0xff] }
 0x3de   : > { %1411 = vadd.xlane.f32.xlu0 %v1410_v8 }
 0x3df   : > { %v841_v11 = vrot.slane %v833_v6, %v3065_v47  ;;  %v848_v12 = vrot.slane %v834_v7, %v3065_v47 }
 0x3e1   : > { %v865_v13 = vcombine.low %v841_v11, %v857_v9  ;;  %v866_v14 = vcombine.high %v841_v11, %v857_v9  ;;  %v881_v15 = vcombine.low %v848_v12, %v864_v10  ;;  %v882_v16 = vcombine.high %v848_v12, %v864_v10 }
 0x3e3   : > { %v3146_v17 = vpop.eup %2311  ;;  %v873_v18 = vrot.slane %v865_v13, %v3067_v53  ;;  %v880_v19 = vrot.slane %v866_v14, %v3067_v53  ;;  %v889_v20 = vrot.slane %v881_v15, %v3067_v53  ;;  %v896_v21 = vrot.slane %v882_v16, %v3067_v53  ;;  %v1621_v13 = vld [vmem:[%s3359_s9 + $0x8] sm:$0xff]  ;;  %v1622_v16 = vld [vmem:[%s3359_s9 + $0x10] sm:$0xff] }
 0x3e4   : > { %v1413_v22 = vsel %vm1194_vm3, %v3146_v17, 0.0  ;;  %v1625_v14 = vpack.c.bf16 %v1621_v13, %v1621_v13 }
 0x3e5   : > { %v901_v23 = vcombine.low %v873_v18, %v880_v19  ;;  %v2033_v24 = vcombine.high %v873_v18, %v880_v19  ;;  %v917_v25 = vcombine.low %v889_v20, %v896_v21  ;;  %v2034_v26 = vcombine.high %v889_v20, %v896_v21  ;;  %1414 = vadd.xlane.f32.xlu0 %v1413_v22 }
 0x3e6   : > { %v1678_v15 = vsel %vm1434_vm4, %v1625_v14, 0  ;;  %v1626_v18 = vpack.c.bf16 %v1622_v16, %v1622_v16 }
 0x3e7   : > { %v3154_v27 = vpop.eup %2313  ;;  %v908_v28 = vrot.slane %v901_v23, %v3065_v47  ;;  %v916_v29 = vrot.slane %v2033_v24, %v3065_v47  ;;  %v924_v30 = vrot.slane %v917_v25, %v3065_v47  ;;  %v932_v31 = vrot.slane %v2034_v26, %v3065_v47 }
 0x3e8   : > { %v1416_v32 = vsel %vm1194_vm3, %v3154_v27, 0.0  ;;  %v1724_v24 = vsel %vm1434_vm4, %v1626_v18, 0 }
 0x3e9   : > { %v933_v33 = vcombine.low %v908_v28, %v916_v29  ;;  %v934_v34 = vcombine.high %v908_v28, %v916_v29  ;;  %v949_v35 = vcombine.low %v924_v30, %v932_v31  ;;  %v950_v36 = vcombine.high %v924_v30, %v932_v31  ;;  %1417 = vadd.xlane.f32.xlu1 %v1416_v32 }
 0x3eb   : > { %v941_v37 = vrot.slane %v933_v33, %v3067_v53  ;;  %v948_v38 = vrot.slane %v934_v34, %v3067_v53  ;;  %v957_v39 = vrot.slane %v949_v35, %v3067_v53  ;;  %v964_v40 = vrot.slane %v950_v36, %v3067_v53 }
 0x3ed   : > { %v965_v41 = vcombine.low %v941_v37, %v957_v39  ;;  %v966_v42 = vcombine.high %v941_v37, %v957_v39  ;;  %v967_v43 = vcombine.low %v948_v38, %v964_v40  ;;  %v968_v47 = vcombine.high %v948_v38, %v964_v40 }
 0x3ef   : > { %v969_v44 = vpack.c.bf16 %v965_v41, %v965_v41  ;;  %v970_v45 = vpack.c.bf16 %v966_v42, %v966_v42  ;;  %v971_v46 = vpack.c.bf16 %v967_v43, %v967_v43  ;;  %v972_v48 = vpack.c.bf16 %v968_v47, %v968_v47 }
 0x3f1   : > { %973 = vst.msk [vmem:[#allocation3] sm:$0xf] %vm818_vm2, %v969_v44  ;;  %974 = vst.msk [vmem:[#allocation3 + $0x4] sm:$0xf] %vm818_vm2, %v970_v45 }
 0x3f2   : > { %975 = vst.msk [vmem:[#allocation3 + $0x8] sm:$0xf] %vm818_vm2, %v971_v46  ;;  %976 = vst.msk [vmem:[#allocation3 + $0xc] sm:$0xf] %vm818_vm2, %v972_v48 }
 0x3f8   : > { %v1190_v49 = vld [vmem:[#allocation3] sm:$0xf]  ;;  %v1191_v50 = vld [vmem:[#allocation3 + $0x4] sm:$0xf] }
 0x3f9   : > { %v1436_v53 = vsel %vm1434_vm4, %v1190_v49, 0  ;;  %v1482_v51 = vsel %vm1434_vm4, %v1191_v50, 0  ;;  %v1192_v61 = vld [vmem:[#allocation3 + $0x8] sm:$0xf]  ;;  %v1193_v1 = vld [vmem:[#allocation3 + $0xc] sm:$0xf] }
 0x3fa   : > { %2138 = vmatpush3.bf16.msra.mxu1 %v1436_v53  ;;  %2144 = vmatpush3.bf16.msra.mxu0 %v1482_v51  ;;  %v1528_v5 = vsel %vm1434_vm4, %v1192_v61, 0 }
 0x3fb   : > { %2149 = vmatprep.subr.bf16.mxu1 %v2630_v0  ;;  %2155 = vmatprep.subr.bf16.mxu0 %v2630_v0 }
 0x46a   : > { %v1409_v52 = vpop.xlane.xlu1 %1408 }
 0x46b   : > { %2315 = vrcp.f32 %v1409_v52  ;;  %v1412_v54 = vpop.xlane.xlu0 %1411 }
 0x46c   : > { %2317 = vrcp.f32 %v1412_v54 }
 0x472   : > { %v1415_v55 = vpop.xlane.xlu0 %1414 }
 0x473   : > { %2319 = vrcp.f32 %v1415_v55 }
 0x475   : > { %v2316_v56 = vpop.eup %2315 }
 0x476   : > { %v2318_v57 = vpop.eup %2317  ;;  %v1423_v58 = vmul.f32 %v2316_v56, %v3134_v62  ;;  %v1418_v59 = vpop.xlane.xlu1 %1417  ;;  %v1574_v62 = vsel %vm1434_vm4, %v1193_v1, 0 }
 0x477   : > { %v1424_v60 = vmul.f32 %v2318_v57, %v3136_v3  ;;  %2321 = vrcp.f32 %v1418_v59  ;;  %v1624_v3 = vpack.c.bf16 %v1620_v4, %v1620_v4 }
 0x478   : > { %v1427_v63 = vpack.c.bf16 %v1423_v58, %v1423_v58 }
 0x479   : > { %v1428_v2 = vpack.c.bf16 %v1424_v60, %v1424_v60  ;;  %v1632_v9 = vsel %vm1434_vm4, %v1624_v3, 0  ;;  %v2051_v60 = vld [vmem:[%s3361_s15] ss:$0 sm:$0xff] }
 0x47a   : > { %2140 = vmatmul.mubr.msk.bf16.vlgmr.msra.gmra.mrb[12].mxu1 %vm1194_vm3, %v1427_v63 }
 0x47b   : > { %2146 = vmatmul.mubr.msk.bf16.vlgmr.msra.gmra.mrb[16].mxu0 %vm1194_vm3, %v1428_v2  ;;  %2150 = vmatpush3.bf16.msra.mxu1 %v1528_v5 }
 0x47c   : > { %2156 = vmatpush3.bf16.msra.mxu0 %v1574_v62  ;;  %2151 = vmatprep.mubr.msk.bf16.mxu1 %vm2631_vm0, %v2630_v0 }
 0x47d   : > { %v2320_v6 = vpop.eup %2319  ;;  %2157 = vmatprep.mubr.msk.bf16.mxu0 %vm2631_vm0, %v2630_v0  ;;  %2161 = vmatprep.subr.bf16.mxu1 %v2630_v0 }
 0x47e   : > { %v1425_v7 = vmul.f32 %v2320_v6, %v3146_v17  ;;  %2167 = vmatprep.subr.bf16.mxu0 %v2630_v0  ;;  %v1623_v17 = vld [vmem:[%s3359_s9 + $0x18] sm:$0xff] }
 0x47f   : > { %v1627_v19 = vpack.c.bf16 %v1623_v17, %v1623_v17 }
 0x480   : > { %v1429_v8 = vpack.c.bf16 %v1425_v7, %v1425_v7 }
 0x481   : > { %v2322_v10 = vpop.eup %2321  ;;  %v1770_v28 = vsel %vm1434_vm4, %v1627_v19, 0 }
 0x482   : > { %v1426_v11 = vmul.f32 %v2322_v10, %v3154_v27  ;;  %2152 = vmatmul.mubr.msk.bf16.vlgmr.msra.gmra.mrb[16].mxu1 %vm1194_vm3, %v1429_v8 }
 0x483   : > { %2162 = vmatpush3.bf16.msra.mxu1 %v1632_v9  ;;  %2163 = vmatprep.mubr.msk.bf16.mxu1 %vm2631_vm0, %v2630_v0 }
 0x484   : > { %v1430_v12 = vpack.c.bf16 %v1426_v11, %v1426_v11  ;;  %2173 = vmatprep.subr.bf16.mxu1 %v2630_v0 }
 0x486   : > { %2158 = vmatmul.mubr.msk.bf16.vlgmr.msra.gmra.mrb[20].mxu0 %vm1194_vm3, %v1430_v12 }
 0x487   : > { %2169 = vmatprep.mubr.msk.bf16.mxu0 %vm2631_vm0, %v2630_v0  ;;  %2168 = vmatpush3.bf16.msra.mxu0 %v1678_v15 }
 0x488   : > { %2179 = vmatprep.subr.bf16.mxu0 %v2630_v0 }
 0x54d   : > { %v1472_v20 = vpop.f32.mrb[12].mxu1 }
 0x54e   : > { %v1616_v21 = vpack.c.bf16 %v1472_v20, %v1472_v20  ;;  %v1518_v22 = vpop.f32.mrb[16].mxu0  ;;  %v2141_v23 = vpop.f32.mrb[13].mxu1 }
 0x54f   : > { %v1617_v25 = vpack.c.bf16 %v1518_v22, %v1518_v22  ;;  %v2147_v26 = vpop.f32.mrb[17].mxu0  ;;  %v1475_v27 = vpop.f32.mrb[14].mxu1 }
 0x550   : > { %v1521_v29 = vpop.f32.mrb[18].mxu0  ;;  %v2142_v30 = vpop.f32.mrb[15].mxu1  ;;  %2164 = vmatmul.mubr.msk.bf16.vlgmr.msra.gmra.mrb[20].mxu1 %vm1194_vm3, %v1616_v21 }
 0x551   : > { %v2148_v31 = vpop.f32.mrb[19].mxu0  ;;  %2170 = vmatmul.mubr.msk.bf16.vlgmr.msra.gmra.mrb[24].mxu0 %vm1194_vm3, %v1617_v25  ;;  %2174 = vmatpush3.bf16.msra.mxu1 %v1724_v24 }
 0x552   : > { %2180 = vmatpush3.bf16.msra.mxu0 %v1770_v28  ;;  %2175 = vmatprep.mubr.msk.bf16.mxu1 %vm2631_vm0, %v2630_v0 }
 0x553   : > { %2181 = vmatprep.mubr.msk.bf16.mxu0 %vm2631_vm0, %v2630_v0 }
 0x555   : > { %v1564_v32 = vpop.f32.mrb[16].mxu1 }
 0x556   : > { %v1618_v33 = vpack.c.bf16 %v1564_v32, %v1564_v32  ;;  %v2153_v34 = vpop.f32.mrb[17].mxu1 }
 0x557   : > { %v1567_v35 = vpop.f32.mrb[18].mxu1 }
 0x558   : > { %v2154_v36 = vpop.f32.mrb[19].mxu1  ;;  %2176 = vmatmul.mubr.msk.bf16.vlgmr.msra.gmra.mrb[24].mxu1 %vm1194_vm3, %v1618_v33 }
 0x559   : > { %v1610_v37 = vpop.f32.mrb[20].mxu0 }
 0x55a   : > { %v1619_v38 = vpack.c.bf16 %v1610_v37, %v1610_v37  ;;  %v2159_v39 = vpop.f32.mrb[21].mxu0 }
 0x55b   : > { %v1613_v40 = vpop.f32.mrb[22].mxu0 }
 0x55c   : > { %v2160_v41 = vpop.f32.mrb[23].mxu0  ;;  %2182 = vmatmul.mubr.msk.bf16.vlgmr.msra.gmra.mrb[28].mxu0 %vm1194_vm3, %v1619_v38 }
 0x623   : > { %v1668_v42 = vpop.f32.mrb[20].mxu1 }
 0x624   : > { %v1812_v43 = vsel %vm568_vm1, %v1668_v42, 0.0  ;;  %v1714_v47 = vpop.f32.mrb[24].mxu0  ;;  %v2165_v44 = vpop.f32.mrb[21].mxu1 }
 0x625   : > { %v1813_v0 = vsel %vm568_vm1, %v1714_v47, 0.0  ;;  %v2171_v45 = vpop.f32.mrb[25].mxu0  ;;  %v1671_v46 = vpop.f32.mrb[22].mxu1 }
 0x626   : > { %v1814_v48 = vadd.f32 %v1813_v0, %v1812_v43  ;;  %v1717_v49 = vpop.f32.mrb[26].mxu0  ;;  %v2166_v50 = vpop.f32.mrb[23].mxu1 }
 0x627   : > { %v2172_v53 = vpop.f32.mrb[27].mxu0 }
 0x62b   : > { %v1760_v51 = vpop.f32.mrb[24].mxu1 }
 0x62c   : > { %v1815_v52 = vsel %vm568_vm1, %v1760_v51, 0.0  ;;  %v2177_v54 = vpop.f32.mrb[25].mxu1 }
 0x62d   : > { %v1816_v55 = vadd.f32 %v1815_v52, %v1814_v48  ;;  %v1763_v56 = vpop.f32.mrb[26].mxu1 }
 0x62e   : > { %v2178_v57 = vpop.f32.mrb[27].mxu1 }
 0x62f   : > { %v1806_v58 = vpop.f32.mrb[28].mxu0 }
 0x630   : > { %v1817_v59 = vsel %vm568_vm1, %v1806_v58, 0.0  ;;  %v2183_v61 = vpop.f32.mrb[29].mxu0 }
 0x631   : > { %v1818_v63 = vadd.f32 %v1817_v59, %v1816_v55  ;;  %v1809_v1 = vpop.f32.mrb[30].mxu0 }
 0x632   : > { %v2184_v2 = vpop.f32.mrb[31].mxu0 }
 0x633   : > { %v1826_v4 = vadd.f32 %v2051_v60, %v1818_v63 }
 0x635   : > { %1827 = vst.msk [vmem:[%s545_s25] sm:$0xff] %vm568_vm1, %v1826_v4 }
 0x636   : > { %2538 = shalt.err (!%p2535_p11)
}
 0x637   : > { %s2539_s21 = scalar_lea.hbm %s3232_s17, 128  ;;  %s2543_s1 = scalar_lea.hbm %s3363_s3, 256 }
 0x638   : > { %p2540_p5 = scmp.ne.s32.totalorder %s3232_s17, %s2539_s21  ;;  %p2544_p0 = scmp.lt.u32.totalorder %s3232_s17, %s3363_s3 }
 0x639   : > { %p2545_p4 = scmp.lt.u32.totalorder %s2543_s1, %s2539_s21  ;;  %p2547_p13 = scmp.lt.u32.totalorder %s2539_s21, %s3232_s17 }
 0x63a   : > { %p2541_p3 = pnand %p2540_p5, %p3364_p2 }
 0x63b   : > { %p2546_p10 = por %p2545_p4, %p2544_p0 }
 0x63c   : > { %p2542_p6 = pneg %p2541_p3 }
 0x63d   : > { %p2548_p1 = por %p2547_p13, %p2546_p10 }
 0x63f   : > { %p2549_p12 = pnand %p2548_p1, %p2542_p6 }
 0x641   : > { %2552 = shalt.err (!%p2549_p12)
}
 0x642   : > { %2207 = dma.vmem_to_hbm [thread:$0]  (%p3364_p2), %s3234_s13, 128, %s3232_s17, %s1829_s30  }
 0x643 PF: > { %s3365_s24 = sld [smem:[#allocation22_spill]]  ;;  %s3366_s12 = sld [smem:[#allocation29_spill]] }
 0x644   : > { %s3367_s15 = sld [smem:[#allocation25_spill]] }
 0x649   : > { %s1855_s23 = sand.u32 1, %s3365_s24   ;;  %p3368_p8 = scmp.ne.s32.totalorder %s3366_s12, 0 }
 0x64a   : > { %p3369_p9 = scmp.ge.s32.totalorder %s3367_s15, 2  ;;  %s1856_s25 = scalar_lea.sflag [#allocation6], %s1855_s23 }
 0x64c   : > { %p2233_p7 = pnand %p3369_p9, %p3368_p8 }
 0x64e   : > { %2594 = dma.done.wait (!%p2233_p7), %s1856_s25, 128  }
 0x64f   : > { %2596 = vsyncadd (!%p2233_p7), %s1856_s25, 4294967168  ;;  %s32_s22 = sadd.s32 1, %s3367_s15   ;;  %s3370_s11 = sld [smem:[#allocation28_spill]] }
 0x650   : > { %p29_p11 = scmp.ge.s32.totalorder %s32_s22, 4   ;;  %s3371_s20 = sld [smem:[#allocation24_spill]] }
 0x651   : > { %s3372_s21 = sld [smem:[#allocation26_spill]]  ;;  %s3373_s17 = smov %s2603_s18 }
 0x652   : > { %s3374_s18 = smov %s2607_s19  ;;  %31 = sbr.rel (!%p29_p11) target bundleno = 17 (0x11), region = 153 }
 0x655   : > { %s3375_s19 = smov %s3370_s11 }
 0x659   :  { %1861 = vsyncpa [#allocation5], 1 }
 0x65a   :  { %1863 = vsyncpa [#allocation5 + $0x1], 1 }
 0x65b   :  { %1864 = vsyncpa [#allocation8], 1 }
 0x65c   :  { %1866 = vsyncpa [#allocation8 + $0x1], 1 }
 0x65d   :  { %1867 = vsyncpa [#allocation11], 1 }
 0x65e   :  { %1868 = vsyncpa [#allocation14], 1 }
 0x65f   :  { %1869 = vsyncpa [#allocation6], 1 }
 0x660   :  { %1871 = vsyncpa [#allocation6 + $0x1], 1 }

</bundles_post_ra>
